<compile_context>
chip_gen: v5e
topology: v5e:2x2
jax: 0.10.0
libtpu: 0.0.40
codegen_flags: <defaults>
</compile_context>

<pallas_src>
import functools

import jax
import jax.numpy as jnp
from jax.experimental import pallas as pl
from jax.experimental.pallas import tpu as pltpu

NF = 32          # nf
UPSCALE = 1      # upscale (pixel shuffle handled in JAX glue for upscale > 1)
TILE_M = 8192    # max pixels per grid step (lane axis)


def _round_up(x, m):
    return ((x + m - 1) // m) * m


def mulut_kernel(p_ref,
                 w1_ref, b1_ref,
                 ws1_ref, ws2_ref, ws3_ref, ws4_ref,
                 b2_ref, b3_ref, b4_ref, b5_ref,
                 w6_ref, b6_ref,
                 o_ref):
    f32 = jnp.float32
    bf16 = jnp.bfloat16
    nf = w1_ref.shape[0]
    r2 = o_ref.shape[0]

    x = p_ref[...]                       # (4, TM)    f32, lane-dense
    w1 = w1_ref[...]                     # (nf, 4)    f32
    w6 = w6_ref[...]                     # (r2, 5*nf) f32

    # conv1: 2x2 conv == K=4 contraction.  Too shallow for the MXU, so do it
    # as four VPU broadcast FMAs in f32.
    f1 = (w1[:, 0:1] * x[0:1, :] + w1[:, 1:2] * x[1:2, :] +
          w1[:, 2:3] * x[2:3, :] + w1[:, 3:4] * x[3:4, :] + b1_ref[...])
    f1 = jnp.maximum(f1, 0.0)            # (nf, TM) f32

    def conv6_vpu(blk, feat_f32):
        # conv6 slice (r2, nf) @ feat (nf, TM) on the VPU/XLU as a weighted
        # sublane reduce: keeps the 1-row conv6 off the MXU, where it would
        # cost a full stationary load per lane tile for ~1% of the FLOPs.
        wblk = w6[:, blk * nf:(blk + 1) * nf]            # (r2, nf) f32
        rows = [jnp.sum(wblk[r, :, None] * feat_f32, axis=0, keepdims=True)
                for r in range(r2)]
        return rows[0] if r2 == 1 else jnp.concatenate(rows, axis=0)

    # ---- producer-driven dense chain (conv2..conv5) -------------------------
    f1_bf = f1.astype(bf16)
    p1 = jnp.dot(ws1_ref[...], f1_bf, preferred_element_type=f32)   # (4nf, TM)
    out_acc = conv6_vpu(0, f1)

    f2 = jnp.maximum(p1[0 * nf:1 * nf, :] + b2_ref[...], 0.0)       # conv2 done
    acc3 = p1[1 * nf:2 * nf, :]
    acc4 = p1[2 * nf:3 * nf, :]
    acc5 = p1[3 * nf:4 * nf, :]

    f2_bf = f2.astype(bf16)
    p2 = jnp.dot(ws2_ref[...], f2_bf, preferred_element_type=f32)   # (3nf, TM)
    out_acc = out_acc + conv6_vpu(1, f2)

    f3 = jnp.maximum(acc3 + p2[0 * nf:1 * nf, :] + b3_ref[...], 0.0)  # conv3
    acc4 = acc4 + p2[1 * nf:2 * nf, :]
    acc5 = acc5 + p2[2 * nf:3 * nf, :]

    f3_bf = f3.astype(bf16)
    p3 = jnp.dot(ws3_ref[...], f3_bf, preferred_element_type=f32)   # (2nf, TM)
    out_acc = out_acc + conv6_vpu(2, f3)

    f4 = jnp.maximum(acc4 + p3[0 * nf:1 * nf, :] + b4_ref[...], 0.0)  # conv4
    acc5 = acc5 + p3[1 * nf:2 * nf, :]

    f4_bf = f4.astype(bf16)
    p4 = jnp.dot(ws4_ref[...], f4_bf, preferred_element_type=f32)   # (nf, TM)
    out_acc = out_acc + conv6_vpu(3, f4)

    f5 = jnp.maximum(acc5 + p4 + b5_ref[...], 0.0)                    # conv5
    out_acc = out_acc + conv6_vpu(4, f5)

    o_ref[...] = jnp.tanh(out_acc + b6_ref[...]).astype(o_ref.dtype)


def make_params(key, nf=NF, upscale=UPSCALE):
    """Kaiming-normal (fan_in, gain=sqrt(2)) f32 weights, zero biases.

    Stored feature-major (out_features, in_features), matching the torch
    Conv2d weight flattened over (in_c, kh, kw)."""
    dims_in = [4, nf, 2 * nf, 3 * nf, 4 * nf, 5 * nf]
    dims_out = [nf, nf, nf, nf, nf, upscale * upscale]
    params = []
    for din, dout in zip(dims_in, dims_out):
        key, sub = jax.random.split(key)
        std = (2.0 / din) ** 0.5
        w = std * jax.random.normal(sub, (dout, din), jnp.float32)
        b = jnp.zeros((dout, 1), jnp.float32)
        params += [w, b]
    return params


def _extract_2x2_patches(x):
    """x: (N, 1, H, W) NCHW -> (4, M), M = N*(H-1)*(W-1).

    Four contiguous planes stacked on axis 0 (feature-major), matching the
    torch conv weight flattening order [(0,0), (0,1), (1,0), (1,1)]."""
    N, C, H, W = x.shape
    assert C == 1
    Ho, Wo = H - 1, W - 1
    p00 = x[:, 0, :Ho, :Wo]
    p01 = x[:, 0, :Ho, 1:]
    p10 = x[:, 0, 1:, :Wo]
    p11 = x[:, 0, 1:, 1:]
    patches = jnp.stack([p00, p01, p10, p11], axis=0).reshape(4, -1)
    return patches, (N, Ho, Wo)


@functools.partial(jax.jit, static_argnames=("upscale", "tile_m"))
def mulut_unit_forward(x, params, upscale=UPSCALE, tile_m=TILE_M):
    """Forward pass of MuLUTUnit. x: (N, 1, H, W) float32 NCHW."""
    patches, (N, Ho, Wo) = _extract_2x2_patches(x)
    M = patches.shape[1]

    # Tile selection: keep the big tile for throughput, but on small inputs
    # shrink it so grid_m >= 2 and both v7x TensorCores get a grid step.
    tm = min(tile_m, max(256, _round_up(pl.cdiv(M, 2), 256)))
    grid_m = pl.cdiv(M, tm)
    M_pad = grid_m * tm
    patches = jnp.pad(patches, ((0, 0), (0, M_pad - M)))

    w1, b1, w2, b2, w3, b3, w4, b4, w5, b5, w6, b6 = params
    nf = w1.shape[0]
    r2 = upscale * upscale
    f32, bf16 = jnp.float32, jnp.bfloat16

    # Stacked "producer" weights: every later layer's slice that consumes
    # feat_i, so each feature block is the MXU stationary operand exactly once.
    # The immediate consumer's rows come first (shortest critical path).
    ws1 = jnp.concatenate([w2, w3[:, :nf], w4[:, :nf], w5[:, :nf]],
                          axis=0).astype(bf16)                       # (4nf, nf)
    ws2 = jnp.concatenate([w3[:, nf:], w4[:, nf:2 * nf], w5[:, nf:2 * nf]],
                          axis=0).astype(bf16)                       # (3nf, nf)
    ws3 = jnp.concatenate([w4[:, 2 * nf:], w5[:, 2 * nf:3 * nf]],
                          axis=0).astype(bf16)                       # (2nf, nf)
    ws4 = w5[:, 3 * nf:].astype(bf16)                                # (nf, nf)

    weight_ops = (w1.astype(f32), b1.astype(f32),
                  ws1, ws2, ws3, ws4,
                  b2.astype(f32), b3.astype(f32), b4.astype(f32), b5.astype(f32),
                  w6.astype(f32), b6.astype(f32))

    in_specs = [pl.BlockSpec((4, tm), lambda i: (0, i))]
    in_specs += [pl.BlockSpec(op.shape, lambda i: (0, 0)) for op in weight_ops]

    weight_bytes = sum(op.size * op.dtype.itemsize for op in weight_ops)
    flops = 2 * M_pad * (4 * nf + 10 * nf * nf + 5 * nf * r2)
    bytes_accessed = M_pad * 4 * (4 + r2) + weight_bytes

    # Scoped-VMEM budget from the actual per-step footprint: f32 temporaries
    # dominate (stacked matmul result <=4nf rows + carried partials 3nf rows
    # + feature maps ~3nf rows) plus double-buffered I/O blocks.
    est = (4 * (10 * nf + 8 * r2 + 8) + 2 * nf + 16 * (4 + r2)) * tm
    vmem_limit = int(min(48 * 2**20, max(32 * 2**20, 3 * est)))

    out = pl.pallas_call(
        mulut_kernel,
        out_shape=jax.ShapeDtypeStruct((r2, M_pad), jnp.float32),
        grid_spec=pltpu.PrefetchScalarGridSpec(
            num_scalar_prefetch=0,
            grid=(grid_m,),
            in_specs=in_specs,
            out_specs=pl.BlockSpec((r2, tm), lambda i: (0, i))),
        compiler_params=pltpu.CompilerParams(
            dimension_semantics=("parallel",),
            vmem_limit_bytes=vmem_limit),
        cost_estimate=pl.CostEstimate(
            flops=flops, transcendentals=M_pad * r2,
            bytes_accessed=bytes_accessed),
    )(patches, *weight_ops)

    out = out[:, :M].reshape(r2, N, Ho, Wo)
    out = jnp.transpose(out, (1, 0, 2, 3))               # (N, r*r, Ho, Wo)
    if upscale > 1:
        r = upscale
        out = out.reshape(N, 1, r, r, Ho, Wo)
        out = out.transpose(0, 1, 4, 2, 5, 3).reshape(N, 1, Ho * r, Wo * r)
    return out


def _reference(x, params, upscale=UPSCALE):
    """Pure-JAX reference mirroring the kernel math (f32 conv1/conv6, bf16
    MXU inputs with f32 accumulation for conv2..conv5)."""
    f32, bf16 = jnp.float32, jnp.bfloat16
    patches, (N, Ho, Wo) = _extract_2x2_patches(x)
    w1, b1, w2, b2, w3, b3, w4, b4, w5, b5, w6, b6 = params

    f1 = jnp.maximum(jnp.dot(w1, patches) + b1, 0.0)
    feats = [f1]
    for w, b in ((w2, b2), (w3, b3), (w4, b4), (w5, b5)):
        c_bf = jnp.concatenate([f.astype(bf16) for f in feats], axis=0)
        f = jnp.maximum(
            jnp.dot(w.astype(bf16), c_bf, preferred_element_type=f32) + b, 0.0)
        feats.append(f)
    c = jnp.concatenate(feats, axis=0)                    # f32 feats for conv6
    out = jnp.tanh(jnp.dot(w6, c) + b6)

    r2 = upscale * upscale
    out = out.reshape(r2, N, Ho, Wo).transpose(1, 0, 2, 3)
    if upscale > 1:
        r = upscale
        out = out.reshape(N, 1, r, r, Ho, Wo)
        out = out.transpose(0, 1, 4, 2, 5, 3).reshape(N, 1, Ho * r, Wo * r)
    return out


if __name__ == "__main__":
    key = jax.random.PRNGKey(0)
    kx, kx2, kp = jax.random.split(key, 3)
    params = make_params(kp, nf=NF, upscale=UPSCALE)

    # Small shape (MuLUTUnit mode='2x2' expects 1 input channel).
    N, C, H, W = 2, 1, 16, 16
    x = jax.random.uniform(kx, (N, C, H, W), jnp.float32)
    y = jax.block_until_ready(mulut_unit_forward(x, params))
    y_ref = _reference(x, params)
    assert y.shape == (N, UPSCALE * UPSCALE, H - 1, W - 1)
    err = float(jnp.max(jnp.abs(y - y_ref)))
    assert err < 1e-2, err

    # Larger shape to exercise the full TILE_M=8192 / multi-step grid path.
    N2, H2, W2 = 1, 128, 128
    x2 = jax.random.uniform(kx2, (N2, 1, H2, W2), jnp.float32)
    y2 = jax.block_until_ready(mulut_unit_forward(x2, params))
    y2_ref = _reference(x2, params)
    assert y2.shape == (N2, UPSCALE * UPSCALE, H2 - 1, W2 - 1)
    err2 = float(jnp.max(jnp.abs(y2 - y2_ref)))
    assert err2 < 1e-2, err2

    print("KERNEL_OK")
</pallas_src>

<mosaic_0001>
module attributes {stable_mosaic.version = 11 : i64} {
  func.func @mulut_kernel(%arg0: i32, %arg1: memref<4x256xf32, #tpu.memory_space<vmem>>, %arg2: memref<32x4xf32, #tpu.memory_space<vmem>>, %arg3: memref<32x1xf32, #tpu.memory_space<vmem>>, %arg4: memref<128x32xbf16, #tpu.memory_space<vmem>>, %arg5: memref<96x32xbf16, #tpu.memory_space<vmem>>, %arg6: memref<64x32xbf16, #tpu.memory_space<vmem>>, %arg7: memref<32x32xbf16, #tpu.memory_space<vmem>>, %arg8: memref<32x1xf32, #tpu.memory_space<vmem>>, %arg9: memref<32x1xf32, #tpu.memory_space<vmem>>, %arg10: memref<32x1xf32, #tpu.memory_space<vmem>>, %arg11: memref<32x1xf32, #tpu.memory_space<vmem>>, %arg12: memref<1x160xf32, #tpu.memory_space<vmem>>, %arg13: memref<1x1xf32, #tpu.memory_space<vmem>>, %arg14: memref<1x256xf32, #tpu.memory_space<vmem>>) attributes {dimension_semantics = [#tpu.dimension_semantics<parallel>], iteration_bounds = array<i64: 2>, scalar_prefetch = 0 : i64, scratch_operands = 0 : i64, tpu.core_type = #tpu.core_type<tc>, window_params = [{transform_indices = @transform_0, window_bounds = array<i64: 4, 256>}, {pipeline_mode = #tpu.pipeline_mode<synchronous>, transform_indices = @transform_1, window_bounds = array<i64: 32, 4>}, {pipeline_mode = #tpu.pipeline_mode<synchronous>, transform_indices = @transform_2, window_bounds = array<i64: 32, 1>}, {pipeline_mode = #tpu.pipeline_mode<synchronous>, transform_indices = @transform_3, window_bounds = array<i64: 128, 32>}, {pipeline_mode = #tpu.pipeline_mode<synchronous>, transform_indices = @transform_4, window_bounds = array<i64: 96, 32>}, {pipeline_mode = #tpu.pipeline_mode<synchronous>, transform_indices = @transform_5, window_bounds = array<i64: 64, 32>}, {pipeline_mode = #tpu.pipeline_mode<synchronous>, transform_indices = @transform_6, window_bounds = array<i64: 32, 32>}, {pipeline_mode = #tpu.pipeline_mode<synchronous>, transform_indices = @transform_7, window_bounds = array<i64: 32, 1>}, {pipeline_mode = #tpu.pipeline_mode<synchronous>, transform_indices = @transform_8, window_bounds = array<i64: 32, 1>}, {pipeline_mode = #tpu.pipeline_mode<synchronous>, transform_indices = @transform_9, window_bounds = array<i64: 32, 1>}, {pipeline_mode = #tpu.pipeline_mode<synchronous>, transform_indices = @transform_10, window_bounds = array<i64: 32, 1>}, {pipeline_mode = #tpu.pipeline_mode<synchronous>, transform_indices = @transform_11, window_bounds = array<i64: 1, 160>}, {pipeline_mode = #tpu.pipeline_mode<synchronous>, transform_indices = @transform_12, window_bounds = array<i64: 1, 1>}, {transform_indices = @transform_13, window_bounds = array<i64: 1, 256>}]} {
    %c0 = arith.constant 0 : index
    %c0_0 = arith.constant 0 : index
    %0 = vector.load %arg1[%c0, %c0_0] : memref<4x256xf32, #tpu.memory_space<vmem>>, vector<4x256xf32>
    %c0_1 = arith.constant 0 : index
    %c0_2 = arith.constant 0 : index
    %1 = vector.load %arg2[%c0_1, %c0_2] : memref<32x4xf32, #tpu.memory_space<vmem>>, vector<32x4xf32>
    %c0_3 = arith.constant 0 : index
    %c0_4 = arith.constant 0 : index
    %2 = vector.load %arg12[%c0_3, %c0_4] : memref<1x160xf32, #tpu.memory_space<vmem>>, vector<1x160xf32>
    %3 = vector.extract_strided_slice %1 {offsets = [0, 0], sizes = [32, 1], strides = [1, 1]} : vector<32x4xf32> to vector<32x1xf32>
    %4 = vector.extract_strided_slice %0 {offsets = [0, 0], sizes = [1, 256], strides = [1, 1]} : vector<4x256xf32> to vector<1x256xf32>
    %5 = vector.broadcast %3 : vector<32x1xf32> to vector<32x256xf32>
    %6 = vector.broadcast %4 : vector<1x256xf32> to vector<32x256xf32>
    %7 = arith.mulf %5, %6 : vector<32x256xf32>
    %8 = vector.extract_strided_slice %1 {offsets = [0, 1], sizes = [32, 1], strides = [1, 1]} : vector<32x4xf32> to vector<32x1xf32>
    %9 = vector.extract_strided_slice %0 {offsets = [1, 0], sizes = [1, 256], strides = [1, 1]} : vector<4x256xf32> to vector<1x256xf32>
    %10 = vector.broadcast %8 : vector<32x1xf32> to vector<32x256xf32>
    %11 = vector.broadcast %9 : vector<1x256xf32> to vector<32x256xf32>
    %12 = arith.mulf %10, %11 : vector<32x256xf32>
    %13 = arith.addf %7, %12 : vector<32x256xf32>
    %14 = vector.extract_strided_slice %1 {offsets = [0, 2], sizes = [32, 1], strides = [1, 1]} : vector<32x4xf32> to vector<32x1xf32>
    %15 = vector.extract_strided_slice %0 {offsets = [2, 0], sizes = [1, 256], strides = [1, 1]} : vector<4x256xf32> to vector<1x256xf32>
    %16 = vector.broadcast %14 : vector<32x1xf32> to vector<32x256xf32>
    %17 = vector.broadcast %15 : vector<1x256xf32> to vector<32x256xf32>
    %18 = arith.mulf %16, %17 : vector<32x256xf32>
    %19 = arith.addf %13, %18 : vector<32x256xf32>
    %20 = vector.extract_strided_slice %1 {offsets = [0, 3], sizes = [32, 1], strides = [1, 1]} : vector<32x4xf32> to vector<32x1xf32>
    %21 = vector.extract_strided_slice %0 {offsets = [3, 0], sizes = [1, 256], strides = [1, 1]} : vector<4x256xf32> to vector<1x256xf32>
    %22 = vector.broadcast %20 : vector<32x1xf32> to vector<32x256xf32>
    %23 = vector.broadcast %21 : vector<1x256xf32> to vector<32x256xf32>
    %24 = arith.mulf %22, %23 : vector<32x256xf32>
    %25 = arith.addf %19, %24 : vector<32x256xf32>
    %c0_5 = arith.constant 0 : index
    %c0_6 = arith.constant 0 : index
    %26 = vector.load %arg3[%c0_5, %c0_6] : memref<32x1xf32, #tpu.memory_space<vmem>>, vector<32x1xf32>
    %27 = vector.broadcast %26 : vector<32x1xf32> to vector<32x256xf32>
    %28 = arith.addf %25, %27 : vector<32x256xf32>
    %cst = arith.constant 0.000000e+00 : f32
    %29 = vector.broadcast %cst : f32 to vector<32x256xf32>
    %30 = arith.maximumf %28, %29 : vector<32x256xf32>
    %31 = arith.truncf %30 : vector<32x256xf32> to vector<32x256xbf16>
    %c0_7 = arith.constant 0 : index
    %c0_8 = arith.constant 0 : index
    %32 = vector.load %arg4[%c0_7, %c0_8] : memref<128x32xbf16, #tpu.memory_space<vmem>>, vector<128x32xbf16>
    %cst_9 = arith.constant dense<0.000000e+00> : vector<128x256xf32>
    %33 = tpu.matmul %32, %31, %cst_9 {dimension_numbers = #tpu.dot_dimension_numbers<[1], [0], [0], [1], [0, 0, 1, 1], [], []>} : vector<128x32xbf16>, vector<32x256xbf16>, vector<128x256xf32> -> vector<128x256xf32>
    %34 = vector.extract_strided_slice %2 {offsets = [0, 0], sizes = [1, 32], strides = [1, 1]} : vector<1x160xf32> to vector<1x32xf32>
    %35 = vector.shape_cast %34 : vector<1x32xf32> to vector<32xf32>
    %36 = vector.shape_cast %35 : vector<32xf32> to vector<32x1xf32>
    %37 = vector.broadcast %36 : vector<32x1xf32> to vector<32x256xf32>
    %38 = arith.mulf %37, %30 : vector<32x256xf32>
    %cst_10 = arith.constant dense<0.000000e+00> : vector<256xf32>
    %39 = vector.multi_reduction <add>, %38, %cst_10 [0] : vector<32x256xf32> to vector<256xf32>
    %40 = vector.shape_cast %39 : vector<256xf32> to vector<1x256xf32>
    %41 = vector.extract_strided_slice %33 {offsets = [0, 0], sizes = [32, 256], strides = [1, 1]} : vector<128x256xf32> to vector<32x256xf32>
    %c0_11 = arith.constant 0 : index
    %c0_12 = arith.constant 0 : index
    %42 = vector.load %arg8[%c0_11, %c0_12] : memref<32x1xf32, #tpu.memory_space<vmem>>, vector<32x1xf32>
    %43 = vector.broadcast %42 : vector<32x1xf32> to vector<32x256xf32>
    %44 = arith.addf %41, %43 : vector<32x256xf32>
    %cst_13 = arith.constant 0.000000e+00 : f32
    %45 = vector.broadcast %cst_13 : f32 to vector<32x256xf32>
    %46 = arith.maximumf %44, %45 : vector<32x256xf32>
    %47 = vector.extract_strided_slice %33 {offsets = [32, 0], sizes = [32, 256], strides = [1, 1]} : vector<128x256xf32> to vector<32x256xf32>
    %48 = vector.extract_strided_slice %33 {offsets = [64, 0], sizes = [32, 256], strides = [1, 1]} : vector<128x256xf32> to vector<32x256xf32>
    %49 = vector.extract_strided_slice %33 {offsets = [96, 0], sizes = [32, 256], strides = [1, 1]} : vector<128x256xf32> to vector<32x256xf32>
    %50 = arith.truncf %46 : vector<32x256xf32> to vector<32x256xbf16>
    %c0_14 = arith.constant 0 : index
    %c0_15 = arith.constant 0 : index
    %51 = vector.load %arg5[%c0_14, %c0_15] : memref<96x32xbf16, #tpu.memory_space<vmem>>, vector<96x32xbf16>
    %cst_16 = arith.constant dense<0.000000e+00> : vector<96x256xf32>
    %52 = tpu.matmul %51, %50, %cst_16 {dimension_numbers = #tpu.dot_dimension_numbers<[1], [0], [0], [1], [0, 0, 1, 1], [], []>} : vector<96x32xbf16>, vector<32x256xbf16>, vector<96x256xf32> -> vector<96x256xf32>
    %53 = vector.extract_strided_slice %2 {offsets = [0, 32], sizes = [1, 32], strides = [1, 1]} : vector<1x160xf32> to vector<1x32xf32>
    %54 = vector.shape_cast %53 : vector<1x32xf32> to vector<32xf32>
    %55 = vector.shape_cast %54 : vector<32xf32> to vector<32x1xf32>
    %56 = vector.broadcast %55 : vector<32x1xf32> to vector<32x256xf32>
    %57 = arith.mulf %56, %46 : vector<32x256xf32>
    %cst_17 = arith.constant dense<0.000000e+00> : vector<256xf32>
    %58 = vector.multi_reduction <add>, %57, %cst_17 [0] : vector<32x256xf32> to vector<256xf32>
    %59 = vector.shape_cast %58 : vector<256xf32> to vector<1x256xf32>
    %60 = arith.addf %40, %59 : vector<1x256xf32>
    %61 = vector.extract_strided_slice %52 {offsets = [0, 0], sizes = [32, 256], strides = [1, 1]} : vector<96x256xf32> to vector<32x256xf32>
    %62 = arith.addf %47, %61 : vector<32x256xf32>
    %c0_18 = arith.constant 0 : index
    %c0_19 = arith.constant 0 : index
    %63 = vector.load %arg9[%c0_18, %c0_19] : memref<32x1xf32, #tpu.memory_space<vmem>>, vector<32x1xf32>
    %64 = vector.broadcast %63 : vector<32x1xf32> to vector<32x256xf32>
    %65 = arith.addf %62, %64 : vector<32x256xf32>
    %cst_20 = arith.constant 0.000000e+00 : f32
    %66 = vector.broadcast %cst_20 : f32 to vector<32x256xf32>
    %67 = arith.maximumf %65, %66 : vector<32x256xf32>
    %68 = vector.extract_strided_slice %52 {offsets = [32, 0], sizes = [32, 256], strides = [1, 1]} : vector<96x256xf32> to vector<32x256xf32>
    %69 = arith.addf %48, %68 : vector<32x256xf32>
    %70 = vector.extract_strided_slice %52 {offsets = [64, 0], sizes = [32, 256], strides = [1, 1]} : vector<96x256xf32> to vector<32x256xf32>
    %71 = arith.addf %49, %70 : vector<32x256xf32>
    %72 = arith.truncf %67 : vector<32x256xf32> to vector<32x256xbf16>
    %c0_21 = arith.constant 0 : index
    %c0_22 = arith.constant 0 : index
    %73 = vector.load %arg6[%c0_21, %c0_22] : memref<64x32xbf16, #tpu.memory_space<vmem>>, vector<64x32xbf16>
    %cst_23 = arith.constant dense<0.000000e+00> : vector<64x256xf32>
    %74 = tpu.matmul %73, %72, %cst_23 {dimension_numbers = #tpu.dot_dimension_numbers<[1], [0], [0], [1], [0, 0, 1, 1], [], []>} : vector<64x32xbf16>, vector<32x256xbf16>, vector<64x256xf32> -> vector<64x256xf32>
    %75 = vector.extract_strided_slice %2 {offsets = [0, 64], sizes = [1, 32], strides = [1, 1]} : vector<1x160xf32> to vector<1x32xf32>
    %76 = vector.shape_cast %75 : vector<1x32xf32> to vector<32xf32>
    %77 = vector.shape_cast %76 : vector<32xf32> to vector<32x1xf32>
    %78 = vector.broadcast %77 : vector<32x1xf32> to vector<32x256xf32>
    %79 = arith.mulf %78, %67 : vector<32x256xf32>
    %cst_24 = arith.constant dense<0.000000e+00> : vector<256xf32>
    %80 = vector.multi_reduction <add>, %79, %cst_24 [0] : vector<32x256xf32> to vector<256xf32>
    %81 = vector.shape_cast %80 : vector<256xf32> to vector<1x256xf32>
    %82 = arith.addf %60, %81 : vector<1x256xf32>
    %83 = vector.extract_strided_slice %74 {offsets = [0, 0], sizes = [32, 256], strides = [1, 1]} : vector<64x256xf32> to vector<32x256xf32>
    %84 = arith.addf %69, %83 : vector<32x256xf32>
    %c0_25 = arith.constant 0 : index
    %c0_26 = arith.constant 0 : index
    %85 = vector.load %arg10[%c0_25, %c0_26] : memref<32x1xf32, #tpu.memory_space<vmem>>, vector<32x1xf32>
    %86 = vector.broadcast %85 : vector<32x1xf32> to vector<32x256xf32>
    %87 = arith.addf %84, %86 : vector<32x256xf32>
    %cst_27 = arith.constant 0.000000e+00 : f32
    %88 = vector.broadcast %cst_27 : f32 to vector<32x256xf32>
    %89 = arith.maximumf %87, %88 : vector<32x256xf32>
    %90 = vector.extract_strided_slice %74 {offsets = [32, 0], sizes = [32, 256], strides = [1, 1]} : vector<64x256xf32> to vector<32x256xf32>
    %91 = arith.addf %71, %90 : vector<32x256xf32>
    %92 = arith.truncf %89 : vector<32x256xf32> to vector<32x256xbf16>
    %c0_28 = arith.constant 0 : index
    %c0_29 = arith.constant 0 : index
    %93 = vector.load %arg7[%c0_28, %c0_29] : memref<32x32xbf16, #tpu.memory_space<vmem>>, vector<32x32xbf16>
    %cst_30 = arith.constant dense<0.000000e+00> : vector<32x256xf32>
    %94 = tpu.matmul %93, %92, %cst_30 {dimension_numbers = #tpu.dot_dimension_numbers<[1], [0], [0], [1], [0, 0, 1, 1], [], []>} : vector<32x32xbf16>, vector<32x256xbf16>, vector<32x256xf32> -> vector<32x256xf32>
    %95 = vector.extract_strided_slice %2 {offsets = [0, 96], sizes = [1, 32], strides = [1, 1]} : vector<1x160xf32> to vector<1x32xf32>
    %96 = vector.shape_cast %95 : vector<1x32xf32> to vector<32xf32>
    %97 = vector.shape_cast %96 : vector<32xf32> to vector<32x1xf32>
    %98 = vector.broadcast %97 : vector<32x1xf32> to vector<32x256xf32>
    %99 = arith.mulf %98, %89 : vector<32x256xf32>
    %cst_31 = arith.constant dense<0.000000e+00> : vector<256xf32>
    %100 = vector.multi_reduction <add>, %99, %cst_31 [0] : vector<32x256xf32> to vector<256xf32>
    %101 = vector.shape_cast %100 : vector<256xf32> to vector<1x256xf32>
    %102 = arith.addf %82, %101 : vector<1x256xf32>
    %103 = arith.addf %91, %94 : vector<32x256xf32>
    %c0_32 = arith.constant 0 : index
    %c0_33 = arith.constant 0 : index
    %104 = vector.load %arg11[%c0_32, %c0_33] : memref<32x1xf32, #tpu.memory_space<vmem>>, vector<32x1xf32>
    %105 = vector.broadcast %104 : vector<32x1xf32> to vector<32x256xf32>
    %106 = arith.addf %103, %105 : vector<32x256xf32>
    %cst_34 = arith.constant 0.000000e+00 : f32
    %107 = vector.broadcast %cst_34 : f32 to vector<32x256xf32>
    %108 = arith.maximumf %106, %107 : vector<32x256xf32>
    %109 = vector.extract_strided_slice %2 {offsets = [0, 128], sizes = [1, 32], strides = [1, 1]} : vector<1x160xf32> to vector<1x32xf32>
    %110 = vector.shape_cast %109 : vector<1x32xf32> to vector<32xf32>
    %111 = vector.shape_cast %110 : vector<32xf32> to vector<32x1xf32>
    %112 = vector.broadcast %111 : vector<32x1xf32> to vector<32x256xf32>
    %113 = arith.mulf %112, %108 : vector<32x256xf32>
    %cst_35 = arith.constant dense<0.000000e+00> : vector<256xf32>
    %114 = vector.multi_reduction <add>, %113, %cst_35 [0] : vector<32x256xf32> to vector<256xf32>
    %115 = vector.shape_cast %114 : vector<256xf32> to vector<1x256xf32>
    %116 = arith.addf %102, %115 : vector<1x256xf32>
    %c0_36 = arith.constant 0 : index
    %c0_37 = arith.constant 0 : index
    %117 = vector.load %arg13[%c0_36, %c0_37] : memref<1x1xf32, #tpu.memory_space<vmem>>, vector<1x1xf32>
    %118 = vector.broadcast %117 : vector<1x1xf32> to vector<1x256xf32>
    %119 = arith.addf %116, %118 : vector<1x256xf32>
    %120 = math.tanh %119 : vector<1x256xf32>
    %c0_38 = arith.constant 0 : index
    %c0_39 = arith.constant 0 : index
    %121 = vector.load %arg14[%c0_38, %c0_39] : memref<1x256xf32, #tpu.memory_space<vmem>>, vector<1x256xf32>
    tpu.vector_store %arg14[%c0_38, %c0_39], %120 {strides = array<i32>} : memref<1x256xf32, #tpu.memory_space<vmem>>, vector<1x256xf32>,
    return
  }
  func.func @transform_0(%arg0: i32) -> (i32, i32) {
    %c0_i32 = arith.constant 0 : i32
    %c0_i32_0 = arith.constant 0 : i32
    return %c0_i32, %arg0 : i32, i32
  }
  func.func @transform_1(%arg0: i32) -> (i32, i32) {
    %c0_i32 = arith.constant 0 : i32
    %c0_i32_0 = arith.constant 0 : i32
    %c0_i32_1 = arith.constant 0 : i32
    return %c0_i32, %c0_i32_0 : i32, i32
  }
  func.func @transform_2(%arg0: i32) -> (i32, i32) {
    %c0_i32 = arith.constant 0 : i32
    %c0_i32_0 = arith.constant 0 : i32
    %c0_i32_1 = arith.constant 0 : i32
    return %c0_i32, %c0_i32_0 : i32, i32
  }
  func.func @transform_3(%arg0: i32) -> (i32, i32) {
    %c0_i32 = arith.constant 0 : i32
    %c0_i32_0 = arith.constant 0 : i32
    %c0_i32_1 = arith.constant 0 : i32
    return %c0_i32, %c0_i32_0 : i32, i32
  }
  func.func @transform_4(%arg0: i32) -> (i32, i32) {
    %c0_i32 = arith.constant 0 : i32
    %c0_i32_0 = arith.constant 0 : i32
    %c0_i32_1 = arith.constant 0 : i32
    return %c0_i32, %c0_i32_0 : i32, i32
  }
  func.func @transform_5(%arg0: i32) -> (i32, i32) {
    %c0_i32 = arith.constant 0 : i32
    %c0_i32_0 = arith.constant 0 : i32
    %c0_i32_1 = arith.constant 0 : i32
    return %c0_i32, %c0_i32_0 : i32, i32
  }
  func.func @transform_6(%arg0: i32) -> (i32, i32) {
    %c0_i32 = arith.constant 0 : i32
    %c0_i32_0 = arith.constant 0 : i32
    %c0_i32_1 = arith.constant 0 : i32
    return %c0_i32, %c0_i32_0 : i32, i32
  }
  func.func @transform_7(%arg0: i32) -> (i32, i32) {
    %c0_i32 = arith.constant 0 : i32
    %c0_i32_0 = arith.constant 0 : i32
    %c0_i32_1 = arith.constant 0 : i32
    return %c0_i32, %c0_i32_0 : i32, i32
  }
  func.func @transform_8(%arg0: i32) -> (i32, i32) {
    %c0_i32 = arith.constant 0 : i32
    %c0_i32_0 = arith.constant 0 : i32
    %c0_i32_1 = arith.constant 0 : i32
    return %c0_i32, %c0_i32_0 : i32, i32
  }
  func.func @transform_9(%arg0: i32) -> (i32, i32) {
    %c0_i32 = arith.constant 0 : i32
    %c0_i32_0 = arith.constant 0 : i32
    %c0_i32_1 = arith.constant 0 : i32
    return %c0_i32, %c0_i32_0 : i32, i32
  }
  func.func @transform_10(%arg0: i32) -> (i32, i32) {
    %c0_i32 = arith.constant 0 : i32
    %c0_i32_0 = arith.constant 0 : i32
    %c0_i32_1 = arith.constant 0 : i32
    return %c0_i32, %c0_i32_0 : i32, i32
  }
  func.func @transform_11(%arg0: i32) -> (i32, i32) {
    %c0_i32 = arith.constant 0 : i32
    %c0_i32_0 = arith.constant 0 : i32
    %c0_i32_1 = arith.constant 0 : i32
    return %c0_i32, %c0_i32_0 : i32, i32
  }
  func.func @transform_12(%arg0: i32) -> (i32, i32) {
    %c0_i32 = arith.constant 0 : i32
    %c0_i32_0 = arith.constant 0 : i32
    %c0_i32_1 = arith.constant 0 : i32
    return %c0_i32, %c0_i32_0 : i32, i32
  }
  func.func @transform_13(%arg0: i32) -> (i32, i32) {
    %c0_i32 = arith.constant 0 : i32
    %c0_i32_0 = arith.constant 0 : i32
    return %c0_i32, %arg0 : i32, i32
  }
}

</mosaic_0001>

<bundles_post_ra>
// kernel: mulut_unit_forward.1
= control target key start
LH: loop header
LB: loop body
LE: loop exit
PB: predicated region body
PF: predicated region fallthrough
CT: control target
= control target key end

     0   :  { %s1963_s27 = smov 0   ;;  %s2368_s0 = inlined_call_operand.vmem [shape: f32[4,512], index: 0, kind: input, shape index: {}]   ;;  %s2369_s1 = inlined_call_operand.vmem [shape: f32[32,4], index: 1, kind: input, shape index: {}]   ;;  %s2370_s2 = inlined_call_operand.vmem [shape: f32[32,1], index: 2, kind: input, shape index: {}]   ;;  %s2371_s3 = inlined_call_operand.vmem [shape: bf16[128,32], index: 3, kind: input, shape index: {}]   ;;  %s2372_s4 = inlined_call_operand.vmem [shape: bf16[96,32], index: 4, kind: input, shape index: {}]   ;;  %s2373_s5 = inlined_call_operand.vmem [shape: bf16[64,32], index: 5, kind: input, shape index: {}]   ;;  %s2374_s6 = inlined_call_operand.vmem [shape: bf16[32,32], index: 6, kind: input, shape index: {}]   ;;  %s2375_s7 = inlined_call_operand.vmem [shape: f32[32,1], index: 7, kind: input, shape index: {}]   ;;  %s2376_s8 = inlined_call_operand.vmem [shape: f32[32,1], index: 8, kind: input, shape index: {}]   ;;  %s2377_s9 = inlined_call_operand.vmem [shape: f32[32,1], index: 9, kind: input, shape index: {}]   ;;  %s2378_s10 = inlined_call_operand.vmem [shape: f32[32,1], index: 10, kind: input, shape index: {}]   ;;  %s2379_s11 = inlined_call_operand.vmem [shape: f32[1,160], index: 11, kind: input, shape index: {}]   ;;  %s2380_s12 = inlined_call_operand.<no memory space> [shape: f32[1,1], index: 12, kind: input, shape index: {}]   ;;  %s2381_s13 = inlined_call_operand.vmem [shape: f32[1,512], index: 13, kind: output, shape index: {}]  }
   0x1   :  { %v18_v0 = vstv %s2380_s12 }
   0x2   :  { %19 = vst [vmem:[#allocation2] sm:$0x1] %v18_v0 }
   0x3 LB: > { %s1672_s28 = sadd.s32 4294967295, %s1884_s27   ;;  %p1676_p0 = scmp.ge.s32.totalorder %s1884_s27, 1  ;;  %s1884_s27 = sphi %s1963_s27, %s25_s27  }
   0x4   : > { %p390_p1 = scmp.lt.s32.totalorder %s1884_s27, 3 }
   0x6   : > { %p391_p2 = pnand %p1676_p0, %p390_p1 }
   0x7   : > { %s1677_s21 = sshll.u32 (!%p391_p2), %s1672_s28, 1 }
   0x8   : > { %394 = sbr.rel (%p391_p2) target bundleno = 889 (0x379), region = 72  ;;  %p434_p3 = scmp.lt.s32.totalorder (!%p391_p2), %s1677_s21, 3 }
   0xd   : > { %v448_v1 = vld [vmem:[%s2369_s1 + $0x10] sm:$0xff]  ;;  %v447_v2 = vld [vmem:[%s2369_s1 + $0x8] sm:$0xff]  ;;  %v1886_v3 = vmov 2   ;;  %v1887_v4 = vmov 1   ;;  %v449_v5 = vld [vmem:[%s2369_s1 + $0x18] sm:$0xff]  ;;  %v1888_v7 = vmov 3   ;;  %v824_v17 = vlaneseq }
   0xe   : > { %1835 = vset.pattern.permute.xlu2 %v1886_v3  ;;  %1838 = vset.pattern.permute.xlu0 %v1887_v4  ;;  %v446_v6 = vld [vmem:[%s2369_s1] sm:$0xff]  ;;  %v1889_v8 = vmov 0   ;;  %v601_v9 = vld [vmem:[%s2370_s2 + $0x8] sm:$0xff]  ;;  %v602_v10 = vld [vmem:[%s2370_s2 + $0x10] sm:$0xff]  ;;  %s2383_s21 = smov (!%p434_p3, %s1677_s21), 3  ;;  %vm700_vm0 = vcmask 261120  }
   0xf   : > { %1834 = vset.pattern.permute.xlu1 %v1887_v4  ;;  %533 = vperm.xlu2 %1835, %v448_v1   ;;  %v1118_v11 = vld [vmem:[%s2376_s8 + $0x10] sm:$0xff]  ;;  %v600_v12 = vld [vmem:[%s2370_s2] sm:$0xff]  ;;  %v603_v13 = vld [vmem:[%s2370_s2 + $0x18] sm:$0xff]  ;;  %v2021_v21 = vshrl.u32 %v824_v17, 7  ;;  %s1678_s22 = sshll.u32 %s2383_s21, 2  ;;  %vm1614_vm1 = vcmask 1040384   ;;  %s442_s29 = scalar_lea.vmem %s2381_s13, %s2383_s21 }
  0x10   : > { %495 = vperm.xlu1 %1834, %v448_v1   ;;  %491 = vperm.xlu0 %1838, %v447_v2   ;;  %v1117_v14 = vld [vmem:[%s2376_s8 + $0x8] sm:$0xff]  ;;  %v877_v15 = vld [vmem:[%s2375_s7 + $0x18] sm:$0xff]  ;;  %v876_v16 = vld [vmem:[%s2375_s7 + $0x10] sm:$0xff]  ;;  %s437_s25 = scalar_lea.vmem %s2368_s0, %s1678_s22  ;;  %vm1619_vm2 = vcmp.lt.s32.totalorder %v824_v17, 256 }
  0x11   : > { %v1334_v18 = vld [vmem:[%s2377_s9] sm:$0xff]  ;;  %v875_v19 = vld [vmem:[%s2375_s7 + $0x8] sm:$0xff]  ;;  %v2024_v22 = vadd.s32 8, %v2021_v21  ;;  %v1119_v24 = vld [vmem:[%s2376_s8 + $0x18] sm:$0xff]  ;;  %v2053_v31 = vadd.s32 16, %v2021_v21  ;;  %v2060_v33 = vadd.s32 24, %v2021_v21 }
  0x12   : > { %v874_v20 = vld [vmem:[%s2375_s7] sm:$0xff]  ;;  %v1337_v27 = vld [vmem:[%s2377_s9 + $0x18] sm:$0xff]  ;;  %v1336_v28 = vld [vmem:[%s2377_s9 + $0x10] sm:$0xff] }
  0x13   : > { %v1116_v23 = vld [vmem:[%s2376_s8] sm:$0xff]  ;;  %v1335_v30 = vld [vmem:[%s2377_s9 + $0x8] sm:$0xff] }
  0x14   : > { %v2036_v25 = vld [vmem:[%s2379_s11] sm:$0x3] }
  0x15   : > { %v2039_v26 = vperm.slane %v2036_v25, 0  ;;  %v445_v46 = vld [vmem:[%s437_s25] sm:$0xff] }
  0x16   : > { %v540_v47 = vperm.slane %v445_v46, 2  ;;  %v541_v49 = vperm.slane %v445_v46, 6  ;;  %v472_v50 = vperm.slane %v445_v46, 0  ;;  %v473_v51 = vperm.slane %v445_v46, 4 }
  0x17   : > { %537 = vperm.xlu2 %1835, %v449_v5   ;;  %v502_v52 = vperm.slane %v445_v46, 1  ;;  %v503_v53 = vperm.slane %v445_v46, 5  ;;  %v578_v55 = vperm.slane %v445_v46, 3  ;;  %v579_v56 = vperm.slane %v445_v46, 7 }
  0x18   : > { %499 = vperm.xlu1 %1834, %v449_v5   ;;  %1843 = vset.pattern.permute.xlu0 %v1888_v7  ;;  %v544_v54 = vperm.slane %v540_v47, 2  ;;  %v545_v57 = vperm.slane %v541_v49, 2  ;;  %v476_v58 = vperm.slane %v472_v50, 0  ;;  %v477_v59 = vperm.slane %v473_v51, 0 }
  0x19   : > { %563 = vperm.xlu0 %1843, %v446_v6   ;;  %v506_v61 = vperm.slane %v502_v52, 1  ;;  %v507_v62 = vperm.slane %v503_v53, 1 }
  0x1f   : > { %1837 = vset.pattern.permute.xlu2 %v1887_v4 }
  0x20   : > { %1836 = vset.pattern.permute.xlu1 %v1889_v8  ;;  %487 = vperm.xlu2 %1837, %v446_v6  }
  0x21   : > { %458 = vperm.xlu1 %1836, %v447_v2   ;;  %1844 = vset.pattern.permute.xlu0 %v1889_v8 }
  0x22   : > { %463 = vperm.xlu0 %1844, %v448_v1  }
  0x28   : > { %1840 = vset.pattern.permute.xlu2 %v1888_v7 }
  0x29   : > { %1839 = vset.pattern.permute.xlu1 %v1888_v7  ;;  %575 = vperm.xlu2 %1840, %v449_v5  }
  0x2a   : > { %571 = vperm.xlu1 %1839, %v448_v1   ;;  %468 = vperm.xlu0 %1844, %v449_v5   ;;  %v582_v1 = vperm.slane %v578_v55, 3 }
  0x31   : > { %1842 = vset.pattern.permute.xlu2 %v1886_v3 }
  0x32   : > { %1841 = vset.pattern.permute.xlu1 %v1886_v3  ;;  %453 = vperm.xlu0 %1844, %v446_v6  }
  0x33   : > { %525 = vperm.xlu1 %1841, %v446_v6   ;;  %529 = vperm.xlu2 %1842, %v447_v2   ;;  %v1058_v6 = vadd.s32 32, %v2021_v21 }
  0x3a   : > { %611 = vperm.xlu0 %1844, %v601_v9  }
  0x3b   : > { %1845 = vset.pattern.permute.xlu1 %v1888_v7  ;;  %1846 = vset.pattern.permute.xlu2 %v1889_v8 }
  0x3c   : > { %567 = vperm.xlu1 %1845, %v447_v2   ;;  %616 = vperm.xlu2 %1846, %v602_v10   ;;  %v583_v2 = vperm.slane %v579_v56, 3 }
  0x42   : > { %1132 = vperm.xlu0 %1844, %v1118_v11  }
  0x44   : > { %1847 = vset.pattern.permute.xlu1 %v1889_v8  ;;  %606 = vperm.xlu2 %1846, %v600_v12  }
  0x45   : > { %621 = vperm.xlu1 %1847, %v603_v13  }
  0x4a   : > { %1127 = vperm.xlu0 %1844, %v1117_v14  }
  0x4c   : > { %895 = vperm.xlu2 %1846, %v877_v15  }
  0x4d   : > { %890 = vperm.xlu1 %1847, %v876_v16  }
  0x52   : > { %1340 = vperm.xlu0 %1844, %v1334_v18  }
  0x54   : > { %885 = vperm.xlu2 %1846, %v875_v19  }
  0x55   : > { %880 = vperm.xlu1 %1847, %v874_v20  }
  0x5a   : > { %1849 = vset.pattern.permute.xlu0 %v2024_v22 }
  0x5c   : > { %1122 = vperm.xlu2 %1846, %v1116_v23  }
  0x5d   : > { %1137 = vperm.xlu1 %1847, %v1119_v24  }
  0x62   : > { %834 = vperm.xlu0 %1849, %v2039_v26  }
  0x64   : > { %1355 = vperm.xlu2 %1846, %v1337_v27  }
  0x65   : > { %1350 = vperm.xlu1 %1847, %v1336_v28  }
  0x69   : > { %v534_v29 = vpop.permute.xlu2 %533 }
  0x6a   : > { %v550_v0 = vmul.f32 %v544_v54, %v534_v29  ;;  %v551_v3 = vmul.f32 %v545_v57, %v534_v29 }
  0x6c   : > { %1848 = vset.pattern.permute.xlu2 %v2021_v21 }
  0x6d   : > { %1345 = vperm.xlu1 %1847, %v1335_v30  }
  0x71   : > { %v2055_v32 = vpop.permute.xlu2 %537 }
  0x72   : > { %v552_v55 = vmul.f32 %v544_v54, %v2055_v32 }
  0x74   : > { %828 = vperm.xlu2 %1848, %v2039_v26  }
  0x75   : > { %1850 = vset.pattern.permute.xlu1 %v2053_v31 }
  0x7a   : > { %v488_v34 = vpop.permute.xlu2 %487 }
  0x7b   : > { %v508_v7 = vmul.f32 %v506_v61, %v488_v34  ;;  %v509_v9 = vmul.f32 %v507_v62, %v488_v34 }
  0x7c   : > { %1851 = vset.pattern.permute.xlu2 %v2060_v33 }
  0x7d   : > { %840 = vperm.xlu1 %1850, %v2039_v26  }
  0x82   : > { %v496_v35 = vpop.permute.xlu1 %495  ;;  %v492_v36 = vpop.permute.xlu0 %491 }
  0x83   : > { %v2064_v37 = vpop.permute.xlu2 %575  ;;  %v512_v13 = vmul.f32 %v506_v61, %v496_v35  ;;  %v513_v14 = vmul.f32 %v507_v62, %v496_v35  ;;  %v510_v18 = vmul.f32 %v506_v61, %v492_v36  ;;  %v511_v19 = vmul.f32 %v507_v62, %v492_v36 }
  0x84   : > { %846 = vperm.xlu2 %1851, %v2039_v26  }
  0x85   : > { %1852 = vset.pattern.permute.xlu1 %v1058_v6 }
  0x8a   : > { %v500_v38 = vpop.permute.xlu1 %499 }
  0x8b   : > { %v2067_v39 = vpop.permute.xlu0 %563  ;;  %v514_v24 = vmul.f32 %v506_v61, %v500_v38  ;;  %v515_v27 = vmul.f32 %v507_v62, %v500_v38  ;;  %v553_v38 = vmul.f32 %v545_v57, %v2055_v32 }
  0x8d   : > { %v530_v40 = vpop.permute.xlu2 %529  ;;  %1060 = vperm.xlu1 %1852, %v2039_v26  }
  0x8e   : > { %v548_v30 = vmul.f32 %v544_v54, %v530_v40 }
  0x93   : > { %v459_v41 = vpop.permute.xlu1 %458 }
  0x94   : > { %v464_v42 = vpop.permute.xlu0 %463  ;;  %v480_v10 = vmul.f32 %v476_v58, %v459_v41  ;;  %v481_v11 = vmul.f32 %v477_v59, %v459_v41 }
  0x95   : > { %v482_v4 = vmul.f32 %v476_v58, %v464_v42  ;;  %v483_v5 = vmul.f32 %v477_v59, %v464_v42  ;;  %v549_v42 = vmul.f32 %v545_v57, %v530_v40  ;;  %v590_v40 = vmul.f32 %v582_v1, %v2064_v37 }
  0x96   : > { %v2073_v43 = vpop.permute.xlu2 %616  ;;  %v518_v34 = vadd.f32 %v510_v18, %v480_v10  ;;  %v519_v46 = vadd.f32 %v511_v19, %v481_v11  ;;  %v1070_v18 = vadd.s32 48, %v2021_v21 }
  0x97   : > { %v520_v28 = vadd.f32 %v512_v13, %v482_v4  ;;  %v521_v29 = vadd.f32 %v513_v14, %v483_v5 }
  0x98   : > { %v556_v4 = vadd.f32 %v548_v30, %v518_v34  ;;  %v557_v5 = vadd.f32 %v549_v42, %v519_v46  ;;  %1854 = vset.pattern.permute.xlu0 %v1070_v18 }
  0x99   : > { %v558_v56 = vadd.f32 %v550_v0, %v520_v28  ;;  %v585_v0 = vmul.f32 %v583_v2, %v2067_v39 }
  0x9c   : > { %v572_v44 = vpop.permute.xlu1 %571  ;;  %v469_v45 = vpop.permute.xlu0 %468 }
  0x9d   : > { %v484_v15 = vmul.f32 %v476_v58, %v469_v45  ;;  %v485_v16 = vmul.f32 %v477_v59, %v469_v45  ;;  %v588_v41 = vmul.f32 %v582_v1, %v572_v44  ;;  %v589_v47 = vmul.f32 %v583_v2, %v572_v44 }
  0x9e   : > { %v2079_v48 = vpop.permute.xlu2 %606 }
  0x9f   : > { %v522_v49 = vadd.f32 %v514_v24, %v484_v15  ;;  %v523_v50 = vadd.f32 %v515_v27, %v485_v16  ;;  %v596_v61 = vadd.f32 %v588_v41, %v558_v56 }
  0xa0   : > { %1072 = vperm.xlu0 %1854, %v2039_v26  }
  0xa1   : > { %v561_v32 = vadd.f32 %v553_v38, %v523_v50 }
  0xa4   : > { %v454_v60 = vpop.permute.xlu0 %453 }
  0xa5   : > { %v526_v63 = vpop.permute.xlu1 %525  ;;  %v478_v20 = vmul.f32 %v476_v58, %v454_v60  ;;  %v479_v23 = vmul.f32 %v477_v59, %v454_v60  ;;  %v559_v58 = vadd.f32 %v551_v3, %v521_v29  ;;  %v591_v59 = vmul.f32 %v583_v2, %v2064_v37 }
  0xa6   : > { %v2082_v12 = vpop.permute.xlu2 %895  ;;  %v546_v45 = vmul.f32 %v544_v54, %v526_v63  ;;  %v547_v52 = vmul.f32 %v545_v57, %v526_v63  ;;  %v560_v54 = vadd.f32 %v552_v55, %v522_v49  ;;  %v584_v57 = vmul.f32 %v582_v1, %v2067_v39 }
  0xa7   : > { %v516_v35 = vadd.f32 %v508_v7, %v478_v20  ;;  %v517_v51 = vadd.f32 %v509_v9, %v479_v23  ;;  %v597_v62 = vadd.f32 %v589_v47, %v559_v58  ;;  %v2094_v9 = vadd.f32 %v2073_v43, %v596_v61 }
  0xa8   : > { %v598_v14 = vadd.f32 %v590_v40, %v560_v54  ;;  %v599_v15 = vadd.f32 %v591_v59, %v561_v32  ;;  %v1803_v40 = vld [vmem:[%s2371_s3 + $0x8] sm:$0xff] }
  0xa9   : > { %v554_v63 = vadd.f32 %v546_v45, %v516_v35  ;;  %v555_v6 = vadd.f32 %v547_v52, %v517_v51  ;;  %v2097_v10 = vadd.f32 %v2073_v43, %v597_v62  ;;  %v636_v23 = vmax.f32 %v2094_v9, 0.0 }
  0xaa   : > { %v1076_v35 = vadd.s32 56, %v2021_v21  ;;  %v1064_v51 = vadd.s32 40, %v2021_v21 }
  0xab   : > { %v592_v11 = vadd.f32 %v584_v57, %v554_v63  ;;  %v593_v13 = vadd.f32 %v585_v0, %v555_v6  ;;  %v637_v24 = vmax.f32 %v2097_v10, 0.0 }
  0xac   : > { %v612_v53 = vpop.permute.xlu0 %611  ;;  %1855 = vset.pattern.permute.xlu1 %v1076_v35  ;;  %1853 = vset.pattern.permute.xlu2 %v1064_v51 }
  0xad   : > { %v624_v28 = vadd.f32 %v2079_v48, %v592_v11  ;;  %v625_v29 = vadd.f32 %v2079_v48, %v593_v13  ;;  %v1802_v48 = vld [vmem:[%s2371_s3] sm:$0xff] }
  0xae   : > { %v568_v36 = vpop.permute.xlu1 %567  ;;  %v2089_v7 = vpop.permute.xlu2 %885 }
  0xaf   : > { %v586_v60 = vmul.f32 %v582_v1, %v568_v36  ;;  %v587_v44 = vmul.f32 %v583_v2, %v568_v36  ;;  %v632_v47 = vmax.f32 %v624_v28, 0.0  ;;  %v633_v49 = vmax.f32 %v625_v29, 0.0 }
  0xb1   : > { %v594_v3 = vadd.f32 %v586_v60, %v556_v4  ;;  %v595_v37 = vadd.f32 %v587_v44, %v557_v5 }
  0xb3   : > { %v626_v39 = vadd.f32 %v612_v53, %v594_v3  ;;  %v627_v2 = vadd.f32 %v612_v53, %v595_v37 }
  0xb4   : > { %v2100_v19 = vpop.permute.xlu0 %1132  ;;  %1078 = vperm.xlu1 %1855, %v2039_v26   ;;  %1066 = vperm.xlu2 %1853, %v2039_v26  }
  0xb5   : > { %v634_v46 = vmax.f32 %v626_v39, 0.0  ;;  %v635_v41 = vmax.f32 %v627_v2, 0.0 }
  0xb6   : > { %v2106_v30 = vpop.permute.xlu2 %1122 }
  0xb7   : > { %v622_v16 = vpop.permute.xlu1 %621  ;;  %v640_v45 = vpack.c.bf16 %v634_v46, %v632_v47  ;;  %v641_v52 = vpack.c.bf16 %v635_v41, %v633_v49 }
  0xb8   : > { %v630_v1 = vadd.f32 %v622_v16, %v598_v14  ;;  %v631_v20 = vadd.f32 %v622_v16, %v599_v15  ;;  %v1804_v16 = vld [vmem:[%s2371_s3 + $0x10] sm:$0xff] }
  0xba   : > { %v638_v43 = vmax.f32 %v630_v1, 0.0  ;;  %v639_v27 = vmax.f32 %v631_v20, 0.0 }
  0xbc   : > { %v642_v42 = vpack.c.bf16 %v638_v43, %v636_v23  ;;  %v643_v34 = vpack.c.bf16 %v639_v27, %v637_v24  ;;  %v2116_v53 = vpop.permute.xlu0 %1127 }
  0xbe   : > { %731 = vmatpush.bf16.msra.mxu0 %v642_v42  ;;  %780 = vmatpush.bf16.msra.mxu1 %v643_v34  ;;  %v2120_v36 = vpop.permute.xlu2 %1355 }
  0xbf   : > { %v2108_v50 = vpop.permute.xlu1 %890 }
  0xc2   : > { %732 = vmatpush.bf16.msra.mxu0 %v640_v45  ;;  %781 = vmatpush.bf16.msra.mxu1 %v641_v52  ;;  %v1805_v52 = vld [vmem:[%s2371_s3 + $0x18] sm:$0xff] }
  0xc4   : > { %v2124_v38 = vpop.permute.xlu0 %1340 }
  0xc5   : > { %1712 = vmatmul.msk.bf16.vlgmr.msra.gmra.mxu0 %vm700_vm0, %v1802_v48  ;;  %1720 = vmatmul.msk.bf16.vlgmr.msra.gmra.mxu1 %vm700_vm0, %v1802_v48 }
  0xc7   : > { %v881_v55 = vpop.permute.xlu1 %880 }
  0xce   : > { %v829_v56 = vpop.permute.xlu2 %828 }
  0xcf   : > { %v848_v58 = vmul.f32 %v829_v56, %v632_v47  ;;  %v2129_v59 = vpop.permute.xlu1 %1137  ;;  %v849_v44 = vmul.f32 %v829_v56, %v633_v49 }
  0xd4   : > { %v835_v60 = vpop.permute.xlu0 %834 }
  0xd5   : > { %v850_v61 = vmul.f32 %v835_v60, %v634_v46  ;;  %v851_v62 = vmul.f32 %v835_v60, %v635_v41  ;;  %1713 = vmatmul.msk.bf16.gmra.mxu0 %vm700_vm0, %v1803_v40  ;;  %1721 = vmatmul.msk.bf16.gmra.mxu1 %vm700_vm0, %v1803_v40 }
  0xd7   : > { %v856_v4 = vadd.f32 %v850_v61, %v848_v58  ;;  %v865_v5 = vadd.f32 %v851_v62, %v849_v44  ;;  %v2133_v63 = vpop.permute.xlu1 %1350  ;;  %v1282_v61 = vadd.s32 72, %v2021_v21  ;;  %v1294_v62 = vadd.s32 88, %v2021_v21 }
  0xd9   : > { %1857 = vset.pattern.permute.xlu1 %v1282_v61  ;;  %1859 = vset.pattern.permute.xlu0 %v1294_v62  ;;  %v1811_v61 = vld [vmem:[%s2372_s4 + $0x8] sm:$0xff] }
  0xda   : > { %v1807_v62 = vld [vmem:[%s2371_s3 + $0x28] sm:$0xff] }
  0xde   : > { %v847_v54 = vpop.permute.xlu2 %846 }
  0xdf   : > { %v2135_v6 = vpop.permute.xlu1 %1345  ;;  %v854_v3 = vmul.f32 %v847_v54, %v638_v43  ;;  %v855_v37 = vmul.f32 %v847_v54, %v639_v27 }
  0xe1   : > { %1284 = vperm.xlu1 %1857, %v2039_v26   ;;  %1296 = vperm.xlu0 %1859, %v2039_v26  }
  0xe5   : > { %1722 = vmatmul.msk.bf16.gmra.mxu1 %vm700_vm0, %v1804_v16  ;;  %1714 = vmatmul.msk.bf16.gmra.mxu0 %vm700_vm0, %v1804_v16 }
  0xe9   : > { %1864 = vset.pattern.permute.xlu0 %v1889_v8 }
  0xef   : > { %v841_v32 = vpop.permute.xlu1 %840 }
  0xf0   : > { %v852_v57 = vmul.f32 %v841_v32, %v636_v23  ;;  %v853_v0 = vmul.f32 %v841_v32, %v637_v24 }
  0xf2   : > { %v857_v9 = vadd.f32 %v856_v4, %v852_v57  ;;  %v866_v10 = vadd.f32 %v865_v5, %v853_v0  ;;  %v1276_v4 = vadd.s32 64, %v2021_v21 }
  0xf4   : > { %v858_v11 = vadd.f32 %v857_v9, %v854_v3  ;;  %v867_v13 = vadd.f32 %v866_v10, %v855_v37  ;;  %1856 = vset.pattern.permute.xlu2 %v1276_v4  ;;  %v1812_v4 = vld [vmem:[%s2372_s4 + $0x10] sm:$0xff] }
  0xf5   : > { %1723 = vmatmul.msk.bf16.gmra.mxu1 %vm700_vm0, %v1805_v52  ;;  %1715 = vmatmul.msk.bf16.gmra.mxu0 %vm700_vm0, %v1805_v52 }
  0xf6   : > { %v859_v44 = vrot.slane %v858_v11, 4  ;;  %v868_v5 = vrot.slane %v867_v13, 4 }
  0xf8   : > { %v860_v37 = vadd.f32 %v859_v44, %v858_v11  ;;  %v869_v10 = vadd.f32 %v868_v5, %v867_v13  ;;  %v1813_v5 = vld [vmem:[%s2372_s4 + $0x18] sm:$0xff] }
  0xfc   : > { %1278 = vperm.xlu2 %1856, %v2039_v26  }
  0xff   : > { %v1061_v27 = vpop.permute.xlu1 %1060 }
 0x10e   : > { %v1067_v28 = vpop.permute.xlu2 %1066 }
 0x126   : > { %v1079_v9 = vpop.permute.xlu1 %1078 }
 0x142   : > { %v734_v14 = vpop.f32.mrf.mxu0  ;;  %v783_v15 = vpop.f32.mrf.mxu1 }
 0x143   : > { %v2142_v18 = vadd.f32 %v881_v55, %v734_v14  ;;  %v2144_v1 = vadd.f32 %v881_v55, %v783_v15  ;;  %v1073_v55 = vpop.permute.xlu0 %1072 }
 0x145   : > { %v906_v2 = vmax.f32 %v2142_v18, 0.0  ;;  %v907_v23 = vmax.f32 %v2144_v1, 0.0 }
 0x147   : > { %v1080_v34 = vmul.f32 %v1061_v27, %v906_v2  ;;  %v1081_v46 = vmul.f32 %v1061_v27, %v907_v23 }
 0x14a   : > { %v736_v20 = vpop.f32.mrf.mxu0  ;;  %v785_v39 = vpop.f32.mrf.mxu1 }
 0x14b   : > { %v900_v24 = vadd.f32 %v2089_v7, %v736_v20  ;;  %v901_v43 = vadd.f32 %v2089_v7, %v785_v39  ;;  %v861_v39 = vrot.slane %v860_v37, 2 }
 0x14d   : > { %v908_v29 = vmax.f32 %v900_v24, 0.0  ;;  %v909_v42 = vmax.f32 %v901_v43, 0.0  ;;  %v870_v24 = vrot.slane %v869_v10, 2 }
 0x14f   : > { %v1082_v41 = vmul.f32 %v1067_v28, %v908_v29  ;;  %v1083_v47 = vmul.f32 %v1067_v28, %v909_v42  ;;  %v914_v28 = vpack.c.bf16 %v908_v29, %v906_v2  ;;  %v915_v13 = vpack.c.bf16 %v909_v42, %v907_v23  ;;  %v1806_v2 = vld [vmem:[%s2371_s3 + $0x20] sm:$0xff] }
 0x150   : > { %1724 = vmatmul.msk.bf16.gmra.mxu1 %vm700_vm0, %v1806_v2  ;;  %1716 = vmatmul.msk.bf16.gmra.mxu0 %vm700_vm0, %v1806_v2 }
 0x151   : > { %v1088_v49 = vadd.f32 %v1082_v41, %v1080_v34  ;;  %v1097_v35 = vadd.f32 %v1083_v47, %v1081_v46  ;;  %v862_v34 = vadd.f32 %v861_v39, %v860_v37  ;;  %v1810_v46 = vld [vmem:[%s2372_s4] sm:$0xff]  ;;  %v871_v41 = vadd.f32 %v870_v24, %v869_v10 }
 0x152   : > { %v739_v51 = vpop.f32.mrf.mxu0  ;;  %v788_v45 = vpop.f32.mrf.mxu1 }
 0x153   : > { %v902_v48 = vadd.f32 %v2108_v50, %v739_v51  ;;  %v903_v7 = vadd.f32 %v2108_v50, %v788_v45  ;;  %v1288_v45 = vadd.s32 80, %v2021_v21  ;;  %v863_v23 = vrot.slane %v862_v34, 1 }
 0x154   : > { %v872_v29 = vrot.slane %v871_v41, 1 }
 0x155   : > { %v910_v56 = vmax.f32 %v902_v48, 0.0  ;;  %v911_v58 = vmax.f32 %v903_v7, 0.0  ;;  %1858 = vset.pattern.permute.xlu2 %v1288_v45 }
 0x157   : > { %v1084_v40 = vmul.f32 %v1073_v55, %v910_v56  ;;  %v1085_v60 = vmul.f32 %v1073_v55, %v911_v58 }
 0x159   : > { %v1089_v54 = vadd.f32 %v1088_v49, %v1084_v40  ;;  %v1098_v32 = vadd.f32 %v1097_v35, %v1085_v60  ;;  %v873_v40 = vadd.f32 %v872_v29, %v871_v41 }
 0x15a   : > { %v741_v50 = vpop.f32.mrf.mxu0  ;;  %v790_v57 = vpop.f32.mrf.mxu1 }
 0x15b   : > { %v904_v0 = vadd.f32 %v2082_v12, %v741_v50  ;;  %v905_v3 = vadd.f32 %v2082_v12, %v790_v57  ;;  %v1815_v50 = vld [vmem:[%s2372_s4 + $0x28] sm:$0xff]  ;;  %v1809_v57 = vld [vmem:[%s2371_s3 + $0x38] sm:$0xff] }
 0x15d   : > { %v912_v14 = vmax.f32 %v904_v0, 0.0  ;;  %v913_v15 = vmax.f32 %v905_v3, 0.0  ;;  %1290 = vperm.xlu2 %1858, %v2039_v26  }
 0x15f   : > { %v1086_v16 = vmul.f32 %v1079_v9, %v912_v14  ;;  %v1087_v18 = vmul.f32 %v1079_v9, %v913_v15  ;;  %v916_v1 = vpack.c.bf16 %v912_v14, %v910_v56  ;;  %v917_v20 = vpack.c.bf16 %v913_v15, %v911_v58 }
 0x160   : > { %v864_v58 = vadd.f32 %v863_v23, %v862_v34  ;;  %1725 = vmatmul.msk.bf16.gmra.mxu1 %vm700_vm0, %v1807_v62  ;;  %1717 = vmatmul.msk.bf16.gmra.mxu0 %vm700_vm0, %v1807_v62  ;;  %v1279_v34 = vpop.permute.xlu2 %1278 }
 0x161   : > { %v1090_v43 = vadd.f32 %v1089_v54, %v1086_v16  ;;  %v1099_v27 = vadd.f32 %v1098_v32, %v1087_v18  ;;  %984 = vmatpush.bf16.msra.mxu2 %v916_v1  ;;  %1023 = vmatpush.bf16.msra.mxu3 %v917_v20  ;;  %v1814_v54 = vld [vmem:[%s2372_s4 + $0x20] sm:$0xff]  ;;  %v1808_v32 = vld [vmem:[%s2371_s3 + $0x30] sm:$0xff] }
 0x162   : > { %v793_v0 = vpop.f32.mrf.mxu1  ;;  %v744_v3 = vpop.f32.mrf.mxu0 }
 0x163   : > { %v1091_v12 = vrot.slane %v1090_v43, 4  ;;  %v1100_v11 = vrot.slane %v1099_v27, 4 }
 0x165   : > { %v1092_v47 = vadd.f32 %v1091_v12, %v1090_v43  ;;  %v1101_v49 = vadd.f32 %v1100_v11, %v1099_v27  ;;  %985 = vmatpush.bf16.msra.mxu2 %v914_v28  ;;  %1024 = vmatpush.bf16.msra.mxu3 %v915_v13  ;;  %v1446_v13 = vadd.s32 96, %v2021_v21 }
 0x166   : > { %1861 = vset.pattern.permute.xlu2 %v1889_v8 }
 0x167   : > { %v1093_v35 = vrot.slane %v1092_v47, 2  ;;  %v1102_v51 = vrot.slane %v1101_v49, 2  ;;  %1860 = vset.pattern.permute.xlu1 %v1446_v13 }
 0x168   : > { %1752 = vmatmul.msk.bf16.vlgmr.msra.gmra.mxu2 %vm700_vm0, %v1810_v46  ;;  %1758 = vmatmul.msk.bf16.vlgmr.msra.gmra.mxu3 %vm700_vm0, %v1810_v46  ;;  %v1285_v46 = vpop.permute.xlu1 %1284 }
 0x169   : > { %v1094_v42 = vadd.f32 %v1093_v35, %v1092_v47  ;;  %v1103_v52 = vadd.f32 %v1102_v51, %v1101_v49 }
 0x16a   : > { %v795_v14 = vpop.f32.mrf.mxu1  ;;  %v746_v16 = vpop.f32.mrf.mxu0 }
 0x16b   : > { %v1095_v48 = vrot.slane %v1094_v42, 1  ;;  %v1104_v7 = vrot.slane %v1103_v52, 1 }
 0x16d   : > { %v1096_v55 = vadd.f32 %v1095_v48, %v1094_v42  ;;  %v1105_v56 = vadd.f32 %v1104_v7, %v1103_v52 }
 0x16f   : > { %v2177_v60 = vadd.f32 %v1096_v55, %v864_v58  ;;  %v2179_v44 = vadd.f32 %v1105_v56, %v873_v40  ;;  %1448 = vperm.xlu1 %1860, %v2039_v26  }
 0x170   : > { %1726 = vmatmul.msk.bf16.gmra.mxu1 %vm700_vm0, %v1808_v32  ;;  %1718 = vmatmul.msk.bf16.gmra.mxu0 %vm700_vm0, %v1808_v32 }
 0x172   : > { %v798_v41 = vpop.f32.mrf.mxu1  ;;  %v749_v49 = vpop.f32.mrf.mxu0 }
 0x177   : > { %1862 = vset.pattern.permute.xlu1 %v1889_v8 }
 0x178   : > { %1753 = vmatmul.msk.bf16.gmra.mxu2 %vm700_vm0, %v1811_v61  ;;  %1759 = vmatmul.msk.bf16.gmra.mxu3 %vm700_vm0, %v1811_v61 }
 0x17a   : > { %v800_v61 = vpop.f32.mrf.mxu1  ;;  %v751_v62 = vpop.f32.mrf.mxu0 }
 0x180   : > { %1727 = vmatmul.msk.bf16.gmra.mxu1 %vm700_vm0, %v1809_v57  ;;  %1719 = vmatmul.msk.bf16.gmra.mxu0 %vm700_vm0, %v1809_v57 }
 0x188   : > { %1760 = vmatmul.msk.bf16.gmra.mxu3 %vm700_vm0, %v1812_v4  ;;  %1754 = vmatmul.msk.bf16.gmra.mxu2 %vm700_vm0, %v1812_v4 }
 0x198   : > { %1761 = vmatmul.msk.bf16.gmra.mxu3 %vm700_vm0, %v1813_v5  ;;  %1755 = vmatmul.msk.bf16.gmra.mxu2 %vm700_vm0, %v1813_v5 }
 0x1a8   : > { %1762 = vmatmul.msk.bf16.gmra.mxu3 %vm700_vm0, %v1814_v54  ;;  %1756 = vmatmul.msk.bf16.gmra.mxu2 %vm700_vm0, %v1814_v54 }
 0x1b7   : > { %v1291_v56 = vpop.permute.xlu2 %1290 }
 0x1b8   : > { %1763 = vmatmul.msk.bf16.gmra.mxu3 %vm700_vm0, %v1815_v50  ;;  %1757 = vmatmul.msk.bf16.gmra.mxu2 %vm700_vm0, %v1815_v50  ;;  %v1506_v50 = vld [vmem:[%s2378_s10 + $0x10] sm:$0xff] }
 0x1b9   : > { %1520 = vperm.xlu0 %1864, %v1506_v50  }
 0x1eb   : > { %v987_v37 = vpop.f32.mrf.mxu2  ;;  %v1026_v9 = vpop.f32.mrf.mxu3 }
 0x1ec   : > { %v1108_v10 = vadd.f32 %v987_v37, %v744_v3  ;;  %v1109_v15 = vadd.f32 %v1026_v9, %v793_v0 }
 0x1ee   : > { %v2224_v18 = vadd.f32 %v2106_v30, %v1108_v10  ;;  %v2227_v1 = vadd.f32 %v2106_v30, %v1109_v15  ;;  %v1505_v10 = vld [vmem:[%s2378_s10 + $0x8] sm:$0xff] }
 0x1ef   : > { %1515 = vperm.xlu1 %1862, %v1505_v10   ;;  %v1449_v10 = vpop.permute.xlu1 %1448 }
 0x1f0   : > { %v1148_v27 = vmax.f32 %v2224_v18, 0.0  ;;  %v1149_v12 = vmax.f32 %v2227_v1, 0.0 }
 0x1f2   : > { %v1298_v35 = vmul.f32 %v1279_v34, %v1148_v27  ;;  %v1299_v51 = vmul.f32 %v1279_v34, %v1149_v12 }
 0x1f3   : > { %v989_v20 = vpop.f32.mrf.mxu2  ;;  %v1028_v39 = vpop.f32.mrf.mxu3 }
 0x1f4   : > { %v1110_v24 = vadd.f32 %v989_v20, %v746_v16  ;;  %v1111_v43 = vadd.f32 %v1028_v39, %v795_v14  ;;  %v1297_v14 = vpop.permute.xlu0 %1296 }
 0x1f6   : > { %v1142_v11 = vadd.f32 %v2116_v53, %v1110_v24  ;;  %v1143_v28 = vadd.f32 %v2116_v53, %v1111_v43 }
 0x1f8   : > { %v1150_v47 = vmax.f32 %v1142_v11, 0.0  ;;  %v1151_v30 = vmax.f32 %v1143_v28, 0.0 }
 0x1fa   : > { %v1300_v45 = vmul.f32 %v1285_v46, %v1150_v47  ;;  %v1301_v2 = vmul.f32 %v1285_v46, %v1151_v30  ;;  %v1172_v13 = vpack.c.bf16 %v1150_v47, %v1148_v27  ;;  %v1173_v34 = vpack.c.bf16 %v1151_v30, %v1149_v12  ;;  %v1816_v46 = vld [vmem:[%s2373_s5] sm:$0xff] }
 0x1fb   : > { %v992_v23 = vpop.f32.mrf.mxu2  ;;  %v1031_v29 = vpop.f32.mrf.mxu3  ;;  %v1504_v27 = vld [vmem:[%s2378_s10] sm:$0xff] }
 0x1fc   : > { %v1306_v42 = vadd.f32 %v1300_v45, %v1298_v35  ;;  %v1315_v52 = vadd.f32 %v1301_v2, %v1299_v51  ;;  %v1112_v48 = vadd.f32 %v992_v23, %v749_v49  ;;  %v1113_v7 = vadd.f32 %v1031_v29, %v798_v41  ;;  %1510 = vperm.xlu2 %1861, %v1504_v27  }
 0x1fd   : > { %v1464_v45 = vadd.s32 120, %v2021_v21  ;;  %v1452_v23 = vadd.s32 104, %v2021_v21 }
 0x1fe   : > { %v1144_v53 = vadd.f32 %v2100_v19, %v1112_v48  ;;  %v1145_v55 = vadd.f32 %v2100_v19, %v1113_v7  ;;  %v1817_v7 = vld [vmem:[%s2373_s5 + $0x8] sm:$0xff] }
 0x1ff   : > { %1869 = vset.pattern.permute.xlu0 %v1464_v45 }
 0x200   : > { %v1152_v58 = vmax.f32 %v1144_v53, 0.0  ;;  %v1153_v40 = vmax.f32 %v1145_v55, 0.0 }
 0x202   : > { %v1302_v4 = vmul.f32 %v1291_v56, %v1152_v58  ;;  %v1303_v5 = vmul.f32 %v1291_v56, %v1153_v40 }
 0x203   : > { %v994_v54 = vpop.f32.mrf.mxu2  ;;  %v1033_v32 = vpop.f32.mrf.mxu3 }
 0x204   : > { %v1307_v57 = vadd.f32 %v1306_v42, %v1302_v4  ;;  %v1316_v0 = vadd.f32 %v1315_v52, %v1303_v5  ;;  %v1114_v3 = vadd.f32 %v994_v54, %v751_v62  ;;  %v1115_v37 = vadd.f32 %v1033_v32, %v800_v61  ;;  %1863 = vset.pattern.permute.xlu2 %v1452_v23 }
 0x206   : > { %v1146_v19 = vadd.f32 %v2129_v59, %v1114_v3  ;;  %v1147_v9 = vadd.f32 %v2129_v59, %v1115_v37  ;;  %v1458_v59 = vadd.s32 112, %v2021_v21 }
 0x207   : > { %1466 = vperm.xlu0 %1869, %v2039_v26  }
 0x208   : > { %v1154_v15 = vmax.f32 %v1146_v19, 0.0  ;;  %v1155_v16 = vmax.f32 %v1147_v9, 0.0  ;;  %1865 = vset.pattern.permute.xlu1 %v1458_v59 }
 0x20a   : > { %v1304_v18 = vmul.f32 %v1297_v14, %v1154_v15  ;;  %v1305_v1 = vmul.f32 %v1297_v14, %v1155_v16  ;;  %v1174_v20 = vpack.c.bf16 %v1154_v15, %v1152_v58  ;;  %v1175_v39 = vpack.c.bf16 %v1155_v16, %v1153_v40 }
 0x20c   : > { %v1308_v24 = vadd.f32 %v1307_v57, %v1304_v18  ;;  %v1317_v43 = vadd.f32 %v1316_v0, %v1305_v1  ;;  %1222 = vmatpush.bf16.msrb.mxu2 %v1174_v20  ;;  %1251 = vmatpush.bf16.msrb.mxu3 %v1175_v39  ;;  %v803_v57 = vpop.f32.mrf.mxu1  ;;  %v754_v0 = vpop.f32.mrf.mxu0 }
 0x20d   : > { %1454 = vperm.xlu2 %1863, %v2039_v26  }
 0x20e   : > { %v1309_v11 = vrot.slane %v1308_v24, 4  ;;  %v1318_v28 = vrot.slane %v1317_v43, 4 }
 0x20f   : > { %1873 = vset.pattern.permute.xlu0 %v1889_v8 }
 0x210   : > { %v1310_v41 = vadd.f32 %v1309_v11, %v1308_v24  ;;  %v1319_v49 = vadd.f32 %v1318_v28, %v1317_v43  ;;  %1223 = vmatpush.bf16.msrb.mxu2 %v1172_v13  ;;  %1252 = vmatpush.bf16.msrb.mxu3 %v1173_v34 }
 0x211   : > { %1460 = vperm.xlu1 %1865, %v2039_v26   ;;  %v1036_v26 = vpop.f32.mrf.mxu3 }
 0x212   : > { %v1311_v35 = vrot.slane %v1310_v41, 2  ;;  %v1320_v51 = vrot.slane %v1319_v49, 2  ;;  %v1157_v14 = vadd.f32 %v1036_v26, %v803_v57 }
 0x213   : > { %1780 = vmatmul.msk.bf16.vlgmr.msrb.gmra.mxu2 %vm700_vm0, %v1816_v46  ;;  %1784 = vmatmul.msk.bf16.vlgmr.msrb.gmra.mxu3 %vm700_vm0, %v1816_v46 }
 0x214   : > { %v1312_v12 = vadd.f32 %v1311_v35, %v1310_v41  ;;  %v1321_v47 = vadd.f32 %v1320_v51, %v1319_v49  ;;  %v805_v19 = vpop.f32.mrf.mxu1  ;;  %v756_v9 = vpop.f32.mrf.mxu0 }
 0x215   : > { %1866 = vset.pattern.permute.xlu2 %v1889_v8 }
 0x216   : > { %v1313_v30 = vrot.slane %v1312_v12, 1  ;;  %v1322_v2 = vrot.slane %v1321_v47, 1 }
 0x218   : > { %v1314_v29 = vadd.f32 %v1313_v30, %v1312_v12  ;;  %v1323_v42 = vadd.f32 %v1322_v2, %v1321_v47 }
 0x219   : > { %1867 = vset.pattern.permute.xlu1 %v2021_v21  ;;  %v1819_v21 = vld [vmem:[%s2373_s5 + $0x18] sm:$0xff]  ;;  %v1038_v53 = vpop.f32.mrf.mxu3 }
 0x21a   : > { %v2259_v52 = vadd.f32 %v1314_v29, %v2177_v60  ;;  %v2262_v48 = vadd.f32 %v1323_v42, %v2179_v44  ;;  %v1818_v60 = vld [vmem:[%s2373_s5 + $0x10] sm:$0xff]  ;;  %v997_v44 = vpop.f32.mrf.mxu2  ;;  %v1159_v59 = vadd.f32 %v1038_v53, %v805_v19 }
 0x21b   : > { %v1156_v15 = vadd.f32 %v997_v44, %v754_v0 }
 0x21c   : > { %v808_v34 = vpop.f32.mrf.mxu1  ;;  %v759_v49 = vpop.f32.mrf.mxu0 }
 0x221   : > { %v1041_v56 = vpop.f32.mrf.mxu3 }
 0x222   : > { %v999_v55 = vpop.f32.mrf.mxu2 }
 0x223   : > { %1781 = vmatmul.msk.bf16.gmra.mxu2 %vm700_vm0, %v1817_v7  ;;  %1785 = vmatmul.msk.bf16.gmra.mxu3 %vm700_vm0, %v1817_v7  ;;  %v1158_v11 = vadd.f32 %v999_v55, %v756_v9 }
 0x229   : > { %v2284_v40 = vpop.f32.mrf.mxu3 }
 0x22a   : > { %v1002_v58 = vpop.f32.mrf.mxu2 }
 0x22b   : > { %v1160_v23 = vadd.f32 %v1002_v58, %v759_v49  ;;  %v2312_v9 = vpop.permute.xlu0 %1520  ;;  %v761_v58 = vpop.f32.mrf.mxu0 }
 0x231   : > { %v2288_v62 = vpop.f32.mrf.mxu3 }
 0x232   : > { %v2286_v61 = vpop.f32.mrf.mxu2 }
 0x233   : > { %1782 = vmatmul.msk.bf16.gmra.mxu2 %vm700_vm0, %v1818_v60  ;;  %1786 = vmatmul.msk.bf16.gmra.mxu3 %vm700_vm0, %v1818_v60 }
 0x239   : > { %v2292_v5 = vpop.f32.mrf.mxu3 }
 0x23a   : > { %v2290_v4 = vpop.f32.mrf.mxu2 }
 0x241   : > { %v2296_v32 = vpop.f32.mrf.mxu3 }
 0x242   : > { %v2294_v54 = vpop.f32.mrf.mxu2 }
 0x243   : > { %1783 = vmatmul.msk.bf16.gmra.mxu2 %vm700_vm0, %v1819_v21  ;;  %1787 = vmatmul.msk.bf16.gmra.mxu3 %vm700_vm0, %v1819_v21 }
 0x249   : > { %v2300_v3 = vpop.f32.mrf.mxu3 }
 0x24a   : > { %v2298_v50 = vpop.f32.mrf.mxu2 }
 0x252   : > { %v2302_v37 = vpop.f32.mrf.mxu2 }
 0x256   : > { %v2304_v39 = vpop.permute.xlu2 %1510 }
 0x261   : > { %v2308_v45 = vpop.permute.xlu1 %1515 }
 0x267   : > { %v1455_v47 = vpop.permute.xlu2 %1454 }
 0x296   : > { %v1225_v16 = vpop.f32.mrf.mxu2  ;;  %v1254_v18 = vpop.f32.mrf.mxu3 }
 0x297   : > { %v1326_v1 = vadd.f32 %v1225_v16, %v1156_v15  ;;  %v1327_v20 = vadd.f32 %v1254_v18, %v1157_v14  ;;  %v1461_v15 = vpop.permute.xlu1 %1460  ;;  %v1545_v18 = vperm.slane %v2036_v25, 1 }
 0x299   : > { %v1358_v24 = vadd.f32 %v2124_v38, %v1326_v1  ;;  %v1359_v43 = vadd.f32 %v2124_v38, %v1327_v20  ;;  %v1161_v38 = vadd.f32 %v1041_v56, %v808_v34  ;;  %v1162_v20 = vadd.f32 %v2286_v61, %v761_v58  ;;  %v1467_v61 = vpop.permute.xlu0 %1466 }
 0x29b   : > { %v1366_v35 = vmax.f32 %v1358_v24, 0.0  ;;  %v1367_v51 = vmax.f32 %v1359_v43, 0.0 }
 0x29d   : > { %v1468_v29 = vmul.f32 %v1449_v10, %v1366_v35  ;;  %v1469_v42 = vmul.f32 %v1449_v10, %v1367_v51 }
 0x29e   : > { %v1227_v28 = vpop.f32.mrf.mxu2  ;;  %v1256_v13 = vpop.f32.mrf.mxu3 }
 0x29f   : > { %v1328_v46 = vadd.f32 %v1227_v28, %v1158_v11  ;;  %v1329_v41 = vadd.f32 %v1256_v13, %v1159_v59  ;;  %v1547_v28 = vperm.slane %v1545_v18, 0 }
 0x2a1   : > { %v1360_v27 = vadd.f32 %v2135_v6, %v1328_v46  ;;  %v1361_v12 = vadd.f32 %v2135_v6, %v1329_v41  ;;  %v810_v6 = vpop.f32.mrf.mxu1  ;;  %1552 = vperm.xlu1 %1867, %v1547_v28  }
 0x2a2   : > { %v1163_v1 = vadd.f32 %v2284_v40, %v810_v6 }
 0x2a3   : > { %v1368_v30 = vmax.f32 %v1360_v27, 0.0  ;;  %v1369_v2 = vmax.f32 %v1361_v12, 0.0 }
 0x2a5   : > { %v1470_v7 = vmul.f32 %v1455_v47, %v1368_v30  ;;  %v1471_v60 = vmul.f32 %v1455_v47, %v1369_v2  ;;  %v1382_v21 = vpack.c.bf16 %v1368_v30, %v1366_v35  ;;  %v1383_v26 = vpack.c.bf16 %v1369_v2, %v1367_v51 }
 0x2a6   : > { %v1230_v44 = vpop.f32.mrf.mxu2  ;;  %v1259_v53 = vpop.f32.mrf.mxu3 }
 0x2a7   : > { %v1476_v55 = vadd.f32 %v1470_v7, %v1468_v29  ;;  %v1485_v57 = vadd.f32 %v1471_v60, %v1469_v42  ;;  %v1330_v0 = vadd.f32 %v1230_v44, %v1160_v23  ;;  %v1331_v19 = vadd.f32 %v1259_v53, %v1161_v38 }
 0x2a9   : > { %v1362_v14 = vadd.f32 %v2133_v63, %v1330_v0  ;;  %v1363_v56 = vadd.f32 %v2133_v63, %v1331_v19  ;;  %v1507_v63 = vld [vmem:[%s2378_s10 + $0x18] sm:$0xff]  ;;  %1870 = vset.pattern.permute.xlu1 %v2053_v31  ;;  %v1821_v19 = vld [vmem:[%s2374_s6 + $0x8] sm:$0xff]  ;;  %v813_v6 = vpop.f32.mrf.mxu1 }
 0x2aa   : > { %1525 = vperm.xlu2 %1866, %v1507_v63   ;;  %v1165_v18 = vadd.f32 %v2288_v62, %v813_v6 }
 0x2ab   : > { %v1370_v10 = vmax.f32 %v1362_v14, 0.0  ;;  %v1371_v16 = vmax.f32 %v1363_v56, 0.0 }
 0x2ad   : > { %v1472_v24 = vmul.f32 %v1461_v15, %v1370_v10  ;;  %v1473_v43 = vmul.f32 %v1461_v15, %v1371_v16 }
 0x2ae   : > { %v1232_v59 = vpop.f32.mrf.mxu2  ;;  %v1261_v11 = vpop.f32.mrf.mxu3 }
 0x2af   : > { %v1477_v13 = vadd.f32 %v1476_v55, %v1472_v24  ;;  %v1486_v34 = vadd.f32 %v1485_v57, %v1473_v43  ;;  %v1332_v46 = vadd.f32 %v1232_v59, %v1162_v20  ;;  %v1333_v41 = vadd.f32 %v1261_v11, %v1163_v1 }
 0x2b1   : > { %v1364_v25 = vadd.f32 %v2120_v36, %v1332_v46  ;;  %v1365_v40 = vadd.f32 %v2120_v36, %v1333_v41  ;;  %v1820_v36 = vld [vmem:[%s2374_s6] sm:$0xff]  ;;  %1564 = vperm.xlu1 %1870, %v1547_v28  }
 0x2b2   : > { %1868 = vset.pattern.permute.xlu2 %v2024_v22 }
 0x2b3   : > { %v1372_v49 = vmax.f32 %v1364_v25, 0.0  ;;  %v1373_v35 = vmax.f32 %v1365_v40, 0.0 }
 0x2b5   : > { %v1474_v51 = vmul.f32 %v1467_v61, %v1372_v49  ;;  %v1475_v27 = vmul.f32 %v1467_v61, %v1373_v35  ;;  %v1384_v12 = vpack.c.bf16 %v1372_v49, %v1370_v10  ;;  %v1385_v47 = vpack.c.bf16 %v1373_v35, %v1371_v16 }
 0x2b6   : > { %v1235_v15 = vpop.f32.mrf.mxu2 }
 0x2b7   : > { %v1478_v30 = vadd.f32 %v1477_v13, %v1474_v51  ;;  %v1487_v2 = vadd.f32 %v1486_v34, %v1475_v27  ;;  %1412 = vmatpush.bf16.msrb.mxu0 %v1384_v12  ;;  %1431 = vmatpush.bf16.msrb.mxu1 %v1385_v47 }
 0x2b9   : > { %v1479_v38 = vrot.slane %v1478_v30, 4  ;;  %v1488_v23 = vrot.slane %v1487_v2, 4  ;;  %1872 = vset.pattern.permute.xlu1 %v1889_v8  ;;  %v1264_v8 = vpop.f32.mrf.mxu3 }
 0x2ba   : > { %1558 = vperm.xlu2 %1868, %v1547_v28   ;;  %v1375_v11 = vadd.f32 %v1264_v8, %v1165_v18 }
 0x2bb   : > { %v1480_v29 = vadd.f32 %v1479_v38, %v1478_v30  ;;  %v1489_v42 = vadd.f32 %v1488_v23, %v1487_v2  ;;  %1413 = vmatpush.bf16.msrb.mxu0 %v1382_v21  ;;  %1432 = vmatpush.bf16.msrb.mxu1 %v1383_v26  ;;  %v1600_v26 = vld [vmem:[#allocation2] sm:$0x1] }
 0x2bc   : > { %1603 = vperm.xlu1 %1872, %v1600_v26  }
 0x2bd   : > { %v1481_v7 = vrot.slane %v1480_v29, 2  ;;  %v1490_v60 = vrot.slane %v1489_v42, 2 }
 0x2be   : > { %1796 = vmatmul.msk.bf16.vlgmr.msrb.gmra.mxu0 %vm700_vm0, %v1820_v36  ;;  %1798 = vmatmul.msk.bf16.vlgmr.msrb.gmra.mxu1 %vm700_vm0, %v1820_v36  ;;  %v1237_v1 = vpop.f32.mrf.mxu2 }
 0x2bf   : > { %v1482_v44 = vadd.f32 %v1481_v7, %v1480_v29  ;;  %v1491_v53 = vadd.f32 %v1490_v60, %v1489_v42 }
 0x2c1   : > { %v1483_v31 = vrot.slane %v1482_v44, 1  ;;  %v1492_v55 = vrot.slane %v1491_v53, 1  ;;  %v1266_v43 = vpop.f32.mrf.mxu3 }
 0x2c2   : > { %1871 = vset.pattern.permute.xlu2 %v2060_v33 }
 0x2c3   : > { %v1484_v22 = vadd.f32 %v1483_v31, %v1482_v44  ;;  %v1493_v57 = vadd.f32 %v1492_v55, %v1491_v53 }
 0x2c5   : > { %v2332_v0 = vadd.f32 %v1484_v22, %v2259_v52  ;;  %v2335_v21 = vadd.f32 %v1493_v57, %v2262_v48  ;;  %v764_v52 = vpop.f32.mrf.mxu0  ;;  %v815_v48 = vpop.f32.mrf.mxu1 }
 0x2c6   : > { %v1164_v33 = vadd.f32 %v2290_v4, %v764_v52  ;;  %v1167_v41 = vadd.f32 %v2292_v5, %v815_v48  ;;  %v1240_v35 = vpop.f32.mrf.mxu2 }
 0x2c8   : > { %v1374_v24 = vadd.f32 %v1235_v15, %v1164_v33  ;;  %v1377_v40 = vadd.f32 %v1266_v43, %v1167_v41 }
 0x2c9   : > { %v1269_v27 = vpop.f32.mrf.mxu3 }
 0x2ca   : > { %1570 = vperm.xlu2 %1871, %v1547_v28  }
 0x2cd   : > { %v766_v14 = vpop.f32.mrf.mxu0  ;;  %v818_v58 = vpop.f32.mrf.mxu1 }
 0x2ce   : > { %1797 = vmatmul.msk.bf16.gmra.mxu0 %vm700_vm0, %v1821_v19  ;;  %1799 = vmatmul.msk.bf16.gmra.mxu1 %vm700_vm0, %v1821_v19  ;;  %v1166_v46 = vadd.f32 %v2294_v54, %v766_v14  ;;  %v1169_v36 = vadd.f32 %v2296_v32, %v818_v58  ;;  %v1242_v52 = vpop.f32.mrf.mxu2 }
 0x2d0   : > { %v1376_v63 = vadd.f32 %v1237_v1, %v1166_v46  ;;  %v1379_v60 = vadd.f32 %v1269_v27, %v1169_v36 }
 0x2d1   : > { %v1271_v14 = vpop.f32.mrf.mxu3 }
 0x2d5   : > { %v769_v56 = vpop.f32.mrf.mxu0  ;;  %v820_v16 = vpop.f32.mrf.mxu1 }
 0x2d6   : > { %v1168_v38 = vadd.f32 %v2298_v50, %v769_v56  ;;  %v1171_v56 = vadd.f32 %v2300_v3, %v820_v16 }
 0x2d8   : > { %v1378_v29 = vadd.f32 %v1240_v35, %v1168_v38  ;;  %v1381_v33 = vadd.f32 %v1271_v14, %v1171_v56 }
 0x2dd   : > { %v771_v10 = vpop.f32.mrf.mxu0 }
 0x2de   : > { %v1170_v32 = vadd.f32 %v2302_v37, %v771_v10 }
 0x2e0   : > { %v1380_v15 = vadd.f32 %v1242_v52, %v1170_v32 }
 0x304   : > { %v1526_v34 = vpop.permute.xlu2 %1525 }
 0x313   : > { %v1553_v2 = vpop.permute.xlu1 %1552 }
 0x314   : > { %v1559_v5 = vpop.permute.xlu2 %1558 }
 0x323   : > { %v1565_v6 = vpop.permute.xlu1 %1564 }
 0x33b   : > { %v1415_v20 = vpop.f32.mrf.mxu0  ;;  %v1434_v59 = vpop.f32.mrf.mxu1 }
 0x33c   : > { %v1496_v28 = vadd.f32 %v1415_v20, %v1374_v24  ;;  %v1497_v13 = vadd.f32 %v1434_v59, %v1375_v11 }
 0x33e   : > { %v1528_v25 = vadd.f32 %v2304_v39, %v1496_v28  ;;  %v1529_v4 = vadd.f32 %v2304_v39, %v1497_v13  ;;  %v1571_v13 = vpop.permute.xlu2 %1570 }
 0x340   : > { %v1536_v12 = vmax.f32 %v1528_v25, 0.0  ;;  %v1537_v30 = vmax.f32 %v1529_v4, 0.0 }
 0x342   : > { %v1572_v42 = vmul.f32 %v1553_v2, %v1536_v12  ;;  %v1573_v44 = vmul.f32 %v1553_v2, %v1537_v30 }
 0x343   : > { %v1417_v62 = vpop.f32.mrf.mxu0  ;;  %v1436_v49 = vpop.f32.mrf.mxu1 }
 0x344   : > { %v1498_v61 = vadd.f32 %v1417_v62, %v1376_v63  ;;  %v1499_v51 = vadd.f32 %v1436_v49, %v1377_v40 }
 0x346   : > { %v1530_v47 = vadd.f32 %v2308_v45, %v1498_v61  ;;  %v1531_v54 = vadd.f32 %v2308_v45, %v1499_v51  ;;  %v1604_v51 = vpop.permute.xlu1 %1603 }
 0x347   : > { %v1606_v30 = vperm.slane %v1604_v51, 0 }
 0x348   : > { %v1538_v23 = vmax.f32 %v1530_v47, 0.0  ;;  %v1539_v39 = vmax.f32 %v1531_v54, 0.0 }
 0x34a   : > { %v1574_v7 = vmul.f32 %v1559_v5, %v1538_v23  ;;  %v1575_v53 = vmul.f32 %v1559_v5, %v1539_v39 }
 0x34b   : > { %v1420_v31 = vpop.f32.mrf.mxu0  ;;  %v1439_v57 = vpop.f32.mrf.mxu1 }
 0x34c   : > { %v1580_v55 = vadd.f32 %v1574_v7, %v1572_v42  ;;  %v1500_v22 = vadd.f32 %v1420_v31, %v1378_v29  ;;  %v1589_v26 = vadd.f32 %v1575_v53, %v1573_v44  ;;  %v1501_v19 = vadd.f32 %v1439_v57, %v1379_v60 }
 0x34e   : > { %v1532_v45 = vadd.f32 %v2312_v9, %v1500_v22  ;;  %v1533_v50 = vadd.f32 %v2312_v9, %v1501_v19 }
 0x350   : > { %v1540_v48 = vmax.f32 %v1532_v45, 0.0  ;;  %v1541_v58 = vmax.f32 %v1533_v50, 0.0 }
 0x352   : > { %v1576_v8 = vmul.f32 %v1565_v6, %v1540_v48  ;;  %v1577_v18 = vmul.f32 %v1565_v6, %v1541_v58 }
 0x353   : > { %v1422_v1 = vpop.f32.mrf.mxu0  ;;  %v1441_v43 = vpop.f32.mrf.mxu1 }
 0x354   : > { %v1581_v20 = vadd.f32 %v1580_v55, %v1576_v8  ;;  %v1502_v24 = vadd.f32 %v1422_v1, %v1380_v15  ;;  %v1590_v59 = vadd.f32 %v1589_v26, %v1577_v18  ;;  %v1503_v11 = vadd.f32 %v1441_v43, %v1381_v33 }
 0x356   : > { %v1534_v28 = vadd.f32 %v1526_v34, %v1502_v24  ;;  %v1535_v9 = vadd.f32 %v1526_v34, %v1503_v11 }
 0x358   : > { %v1542_v46 = vmax.f32 %v1534_v28, 0.0  ;;  %v1543_v37 = vmax.f32 %v1535_v9, 0.0 }
 0x35a   : > { %v1578_v10 = vmul.f32 %v1571_v13, %v1542_v46  ;;  %v1579_v41 = vmul.f32 %v1571_v13, %v1543_v37 }
 0x35c   : > { %v1582_v63 = vadd.f32 %v1581_v20, %v1578_v10  ;;  %v1591_v3 = vadd.f32 %v1590_v59, %v1579_v41 }
 0x35e   : > { %v1583_v16 = vrot.slane %v1582_v63, 4  ;;  %v1592_v25 = vrot.slane %v1591_v3, 4 }
 0x360   : > { %v1584_v40 = vadd.f32 %v1583_v16, %v1582_v63  ;;  %v1593_v4 = vadd.f32 %v1592_v25, %v1591_v3 }
 0x362   : > { %v1585_v62 = vrot.slane %v1584_v40, 2  ;;  %v1594_v61 = vrot.slane %v1593_v4, 2 }
 0x364   : > { %v1586_v49 = vadd.f32 %v1585_v62, %v1584_v40  ;;  %v1595_v35 = vadd.f32 %v1594_v61, %v1593_v4 }
 0x366   : > { %v1587_v27 = vrot.slane %v1586_v49, 1  ;;  %v1596_v12 = vrot.slane %v1595_v35, 1 }
 0x368   : > { %v1588_v34 = vadd.f32 %v1587_v27, %v1586_v49  ;;  %v1597_v47 = vadd.f32 %v1596_v12, %v1595_v35 }
 0x36a   : > { %v1598_v2 = vadd.f32 %v1588_v34, %v2332_v0  ;;  %v1599_v54 = vadd.f32 %v1597_v47, %v2335_v21 }
 0x36c   : > { %v1607_v5 = vadd.f32 %v1606_v30, %v1598_v2  ;;  %v1608_v38 = vadd.f32 %v1606_v30, %v1599_v54 }
 0x36e   : > { %1874 = vtanh.f32 %v1608_v38 }
 0x36f   : > { %1876 = vtanh.f32 %v1607_v5 }
 0x374   : > { %v1875_v23 = vpop.eup %1874 }
 0x375   : > { %v1613_v36 = vrot.slane %v1875_v23, 7  ;;  %v1877_v39 = vpop.eup %1876 }
 0x377   : > { %v1615_v29 = vsel %vm1614_vm1, %v1877_v39, %v1613_v36 }
 0x378   : > { %1621 = vst.msk [vmem:[%s442_s29] sm:$0x3] %vm1619_vm2, %v1615_v29 }
 0x379 PF: > { %s25_s27 = sadd.s32 1, %s1884_s27  }
 0x37a   : > { %p22_p4 = scmp.ge.s32.totalorder %s25_s27, 4  }
 0x37c   :  { %24 = sbr.rel (!%p22_p4) target bundleno = 3 (0x3), region = 102 }

</bundles_post_ra>
